<compile_context>
chip_gen: v5e
topology: v5e:2x2
jax: 0.10.0
libtpu: 0.0.40
codegen_flags: <defaults>
</compile_context>

<pallas_src>
import jax
import jax.numpy as jnp
from jax.experimental import pallas as pl
from jax.experimental.pallas import tpu as pltpu

IN_SIZE = 8
H_SIZE = 48
D_SIZE = 12
ACTION_SIZE = 4
SEQ_LEN = 8          # fused timesteps per kernel call (was 1)
BATCH = 8            # batched environments (was 1)


def ac_net_kernel(x_ref, h0_ref,
                  w_ih_ref, w_hh_ref, b_ih_ref, b_hh_ref,
                  w_p1_ref, b_p1_ref, w_p2_ref, b_p2_ref,
                  head_ref, h_out_ref):
    """Unrolled GRU over seq -> output at t=0 -> p1 -> leaky_relu -> p2 -> softmax."""
    seq = x_ref.shape[0]

    h = h0_ref[0]                                   # (B, H)

    # Gate weights pre-split on the leading axis: no lane-offset slicing.
    w_ih_r, w_ih_z, w_ih_n = w_ih_ref[0], w_ih_ref[1], w_ih_ref[2]   # (in, H)
    w_hh_r, w_hh_z, w_hh_n = w_hh_ref[0], w_hh_ref[1], w_hh_ref[2]   # (H, H)
    b_ih_r, b_ih_z, b_ih_n = b_ih_ref[0], b_ih_ref[1], b_ih_ref[2]   # (1, H)
    b_hh_r, b_hh_z, b_hh_n = b_hh_ref[0], b_hh_ref[1], b_hh_ref[2]   # (1, H)

    y0 = None
    for t in range(seq):                            # static unroll (seq is compile-time)
        x_t = x_ref[t]                              # (B, in)
        gi_r = jnp.dot(x_t, w_ih_r, preferred_element_type=jnp.float32) + b_ih_r
        gi_z = jnp.dot(x_t, w_ih_z, preferred_element_type=jnp.float32) + b_ih_z
        gi_n = jnp.dot(x_t, w_ih_n, preferred_element_type=jnp.float32) + b_ih_n
        gh_r = jnp.dot(h, w_hh_r, preferred_element_type=jnp.float32) + b_hh_r
        gh_z = jnp.dot(h, w_hh_z, preferred_element_type=jnp.float32) + b_hh_z
        gh_n = jnp.dot(h, w_hh_n, preferred_element_type=jnp.float32) + b_hh_n

        r = jax.nn.sigmoid(gi_r + gh_r)
        z = jax.nn.sigmoid(gi_z + gh_z)
        n = jnp.tanh(gi_n + r * gh_n)
        h = (1.0 - z) * n + z * h
        if t == 0:                                  # forward() uses x[0, :, :]
            y0 = h

    # p = leaky_relu(p1(y0))
    p = jnp.dot(y0, w_p1_ref[...], preferred_element_type=jnp.float32) + b_p1_ref[...]
    p = jnp.where(p >= 0.0, p, 0.01 * p)            # F.leaky_relu default slope

    # logits = p2(p)
    logits = jnp.dot(p, w_p2_ref[...], preferred_element_type=jnp.float32) + b_p2_ref[...]

    # Categorical(logits) -> softmax probabilities (EUP reciprocal)
    m = jnp.max(logits, axis=-1, keepdims=True)
    e = jnp.exp(logits - m)
    probs = e * pl.reciprocal(jnp.sum(e, axis=-1, keepdims=True), approx=True)

    # Single packed output buffer: [0] = logits, [1] = probs.
    head_ref[0] = logits
    head_ref[1] = probs
    h_out_ref[0] = h                                # in-place updated hidden state
    # TODO(synk): the torch.distributions.Categorical object itself is not
    # representable in a kernel; logits/probs above fully define it.


@jax.jit
def ac_net_forward(x, h0, params):
    B = x.shape[1]
    H = h0.shape[-1]
    A = params["w_p2_t"].shape[-1]
    f32 = jnp.float32

    vmem = lambda: pl.BlockSpec(memory_space=pltpu.MemorySpace.VMEM)

    out_shape = (
        jax.ShapeDtypeStruct((2, B, A), f32),       # packed [logits, probs]
        jax.ShapeDtypeStruct((1, B, H), f32),       # updated hidden state
    )

    head, h_new = pl.pallas_call(
        ac_net_kernel,
        out_shape=out_shape,
        in_specs=[vmem() for _ in range(10)],
        out_specs=(vmem(), vmem()),
        input_output_aliases={1: 1},                # h0 buffer reused for h_out
    )(x, h0,
      params["w_ih_g"], params["w_hh_g"], params["b_ih_g"], params["b_hh_g"],
      params["w_p1_t"], params["b_p1"], params["w_p2_t"], params["b_p2"])

    logits, probs = head[0], head[1]
    return logits, probs, h_new


def init_params(key):
    """Deterministic PyTorch-style uniform init; GRU weights stored pre-split
    by gate ((3, in, H), (3, H, H), (3, 1, H)) and linear weights transposed."""
    ks = jax.random.split(key, 8)
    k_gru = 1.0 / jnp.sqrt(H_SIZE)
    k_p1 = 1.0 / jnp.sqrt(H_SIZE)
    k_p2 = 1.0 / jnp.sqrt(D_SIZE)
    u = lambda k, shape, b: jax.random.uniform(k, shape, jnp.float32, -b, b)
    return {
        # nn.GRU weight_ih_l0 (3H, in) -> split per gate [r, z, n], transposed.
        "w_ih_g": u(ks[0], (3, IN_SIZE, H_SIZE), k_gru),
        "w_hh_g": u(ks[1], (3, H_SIZE, H_SIZE), k_gru),
        "b_ih_g": u(ks[2], (3, 1, H_SIZE), k_gru),
        "b_hh_g": u(ks[3], (3, 1, H_SIZE), k_gru),
        # nn.Linear p1: weight (D, H) -> (H, D)
        "w_p1_t": u(ks[4], (H_SIZE, D_SIZE), k_p1),
        "b_p1": u(ks[5], (1, D_SIZE), k_p1),
        # nn.Linear p2: weight (A, D) -> (D, A)
        "w_p2_t": u(ks[6], (D_SIZE, ACTION_SIZE), k_p2),
        "b_p2": u(ks[7], (1, ACTION_SIZE), k_p2),
    }


def ref_forward(x, h0, p):
    """Pure-JAX reference of the PyTorch forward (sanity check)."""
    h = h0[0]
    y0 = None
    for t in range(x.shape[0]):
        gi_r = x[t] @ p["w_ih_g"][0] + p["b_ih_g"][0]
        gi_z = x[t] @ p["w_ih_g"][1] + p["b_ih_g"][1]
        gi_n = x[t] @ p["w_ih_g"][2] + p["b_ih_g"][2]
        gh_r = h @ p["w_hh_g"][0] + p["b_hh_g"][0]
        gh_z = h @ p["w_hh_g"][1] + p["b_hh_g"][1]
        gh_n = h @ p["w_hh_g"][2] + p["b_hh_g"][2]
        r = jax.nn.sigmoid(gi_r + gh_r)
        z = jax.nn.sigmoid(gi_z + gh_z)
        n = jnp.tanh(gi_n + r * gh_n)
        h = (1.0 - z) * n + z * h
        if t == 0:
            y0 = h
    pp = y0 @ p["w_p1_t"] + p["b_p1"]
    pp = jnp.where(pp >= 0.0, pp, 0.01 * pp)
    logits = pp @ p["w_p2_t"] + p["b_p2"]
    probs = jax.nn.softmax(logits, axis=-1)
    return logits, probs, h[None]


if __name__ == "__main__":
    key = jax.random.PRNGKey(0)
    k_param, k_x = jax.random.split(key)

    params = init_params(k_param)
    x = jax.random.normal(k_x, (SEQ_LEN, BATCH, IN_SIZE), dtype=jnp.float32)
    h0 = jnp.zeros((1, BATCH, H_SIZE), dtype=jnp.float32)   # reset_h() (batched)

    logits, probs, h_new = ac_net_forward(x, h0, params)
    jax.block_until_ready((logits, probs, h_new))

    ref_logits, ref_probs, ref_h = ref_forward(x, h0, params)
    assert jnp.allclose(logits, ref_logits, atol=2e-4, rtol=2e-4)
    assert jnp.allclose(h_new, ref_h, atol=2e-4, rtol=2e-4)
    # probs use the EUP approximate reciprocal -> slightly looser tolerance.
    assert jnp.allclose(probs, ref_probs, atol=2e-3, rtol=2e-3)

    print("KERNEL_OK")
</pallas_src>

<mosaic_0001>
module attributes {stable_mosaic.version = 11 : i64} {
  func.func @ac_net_kernel(%arg0: memref<8x8x8xf32, #tpu.memory_space<vmem>>, %arg1: memref<1x8x48xf32, #tpu.memory_space<vmem>>, %arg2: memref<3x8x48xf32, #tpu.memory_space<vmem>>, %arg3: memref<3x48x48xf32, #tpu.memory_space<vmem>>, %arg4: memref<3x1x48xf32, #tpu.memory_space<vmem>>, %arg5: memref<3x1x48xf32, #tpu.memory_space<vmem>>, %arg6: memref<48x12xf32, #tpu.memory_space<vmem>>, %arg7: memref<1x12xf32, #tpu.memory_space<vmem>>, %arg8: memref<12x4xf32, #tpu.memory_space<vmem>>, %arg9: memref<1x4xf32, #tpu.memory_space<vmem>>, %arg10: memref<2x8x4xf32, #tpu.memory_space<vmem>>, %arg11: memref<1x8x48xf32, #tpu.memory_space<vmem>>) attributes {dimension_semantics = [], scalar_prefetch = 0 : i64, scratch_operands = 0 : i64, tpu.core_type = #tpu.core_type<tc>} {
    %c0 = arith.constant 0 : index
    %c0_0 = arith.constant 0 : index
    %c0_1 = arith.constant 0 : index
    %0 = vector.load %arg1[%c0, %c0_0, %c0_1] : memref<1x8x48xf32, #tpu.memory_space<vmem>>, vector<1x8x48xf32>
    %1 = vector.shape_cast %0 : vector<1x8x48xf32> to vector<8x48xf32>
    %c0_2 = arith.constant 0 : index
    %c0_3 = arith.constant 0 : index
    %c0_4 = arith.constant 0 : index
    %2 = vector.load %arg2[%c0_2, %c0_3, %c0_4] : memref<3x8x48xf32, #tpu.memory_space<vmem>>, vector<1x8x48xf32>
    %3 = vector.shape_cast %2 : vector<1x8x48xf32> to vector<8x48xf32>
    %c1 = arith.constant 1 : index
    %c0_5 = arith.constant 0 : index
    %c0_6 = arith.constant 0 : index
    %4 = vector.load %arg2[%c1, %c0_5, %c0_6] : memref<3x8x48xf32, #tpu.memory_space<vmem>>, vector<1x8x48xf32>
    %5 = vector.shape_cast %4 : vector<1x8x48xf32> to vector<8x48xf32>
    %c2 = arith.constant 2 : index
    %c0_7 = arith.constant 0 : index
    %c0_8 = arith.constant 0 : index
    %6 = vector.load %arg2[%c2, %c0_7, %c0_8] : memref<3x8x48xf32, #tpu.memory_space<vmem>>, vector<1x8x48xf32>
    %7 = vector.shape_cast %6 : vector<1x8x48xf32> to vector<8x48xf32>
    %c0_9 = arith.constant 0 : index
    %c0_10 = arith.constant 0 : index
    %c0_11 = arith.constant 0 : index
    %8 = vector.load %arg3[%c0_9, %c0_10, %c0_11] : memref<3x48x48xf32, #tpu.memory_space<vmem>>, vector<1x48x48xf32>
    %9 = vector.shape_cast %8 : vector<1x48x48xf32> to vector<48x48xf32>
    %c1_12 = arith.constant 1 : index
    %c0_13 = arith.constant 0 : index
    %c0_14 = arith.constant 0 : index
    %10 = vector.load %arg3[%c1_12, %c0_13, %c0_14] : memref<3x48x48xf32, #tpu.memory_space<vmem>>, vector<1x48x48xf32>
    %11 = vector.shape_cast %10 : vector<1x48x48xf32> to vector<48x48xf32>
    %c2_15 = arith.constant 2 : index
    %c0_16 = arith.constant 0 : index
    %c0_17 = arith.constant 0 : index
    %12 = vector.load %arg3[%c2_15, %c0_16, %c0_17] : memref<3x48x48xf32, #tpu.memory_space<vmem>>, vector<1x48x48xf32>
    %13 = vector.shape_cast %12 : vector<1x48x48xf32> to vector<48x48xf32>
    %c0_18 = arith.constant 0 : index
    %c0_19 = arith.constant 0 : index
    %c0_20 = arith.constant 0 : index
    %14 = vector.load %arg4[%c0_18, %c0_19, %c0_20] : memref<3x1x48xf32, #tpu.memory_space<vmem>>, vector<1x1x48xf32>
    %15 = vector.shape_cast %14 : vector<1x1x48xf32> to vector<1x48xf32>
    %c1_21 = arith.constant 1 : index
    %c0_22 = arith.constant 0 : index
    %c0_23 = arith.constant 0 : index
    %16 = vector.load %arg4[%c1_21, %c0_22, %c0_23] : memref<3x1x48xf32, #tpu.memory_space<vmem>>, vector<1x1x48xf32>
    %17 = vector.shape_cast %16 : vector<1x1x48xf32> to vector<1x48xf32>
    %c2_24 = arith.constant 2 : index
    %c0_25 = arith.constant 0 : index
    %c0_26 = arith.constant 0 : index
    %18 = vector.load %arg4[%c2_24, %c0_25, %c0_26] : memref<3x1x48xf32, #tpu.memory_space<vmem>>, vector<1x1x48xf32>
    %19 = vector.shape_cast %18 : vector<1x1x48xf32> to vector<1x48xf32>
    %c0_27 = arith.constant 0 : index
    %c0_28 = arith.constant 0 : index
    %c0_29 = arith.constant 0 : index
    %20 = vector.load %arg5[%c0_27, %c0_28, %c0_29] : memref<3x1x48xf32, #tpu.memory_space<vmem>>, vector<1x1x48xf32>
    %21 = vector.shape_cast %20 : vector<1x1x48xf32> to vector<1x48xf32>
    %c1_30 = arith.constant 1 : index
    %c0_31 = arith.constant 0 : index
    %c0_32 = arith.constant 0 : index
    %22 = vector.load %arg5[%c1_30, %c0_31, %c0_32] : memref<3x1x48xf32, #tpu.memory_space<vmem>>, vector<1x1x48xf32>
    %23 = vector.shape_cast %22 : vector<1x1x48xf32> to vector<1x48xf32>
    %c2_33 = arith.constant 2 : index
    %c0_34 = arith.constant 0 : index
    %c0_35 = arith.constant 0 : index
    %24 = vector.load %arg5[%c2_33, %c0_34, %c0_35] : memref<3x1x48xf32, #tpu.memory_space<vmem>>, vector<1x1x48xf32>
    %25 = vector.shape_cast %24 : vector<1x1x48xf32> to vector<1x48xf32>
    %c0_36 = arith.constant 0 : index
    %c0_37 = arith.constant 0 : index
    %c0_38 = arith.constant 0 : index
    %26 = vector.load %arg0[%c0_36, %c0_37, %c0_38] : memref<8x8x8xf32, #tpu.memory_space<vmem>>, vector<1x8x8xf32>
    %27 = vector.shape_cast %26 : vector<1x8x8xf32> to vector<8x8xf32>
    %cst = arith.constant dense<0.000000e+00> : vector<8x48xf32>
    %28 = tpu.matmul %27, %3, %cst {dimension_numbers = #tpu.dot_dimension_numbers<[1], [0], [0], [1], [0, 0, 1, 1], [], []>} : vector<8x8xf32>, vector<8x48xf32>, vector<8x48xf32> -> vector<8x48xf32>
    %29 = vector.broadcast %15 : vector<1x48xf32> to vector<8x48xf32>
    %30 = arith.addf %28, %29 : vector<8x48xf32>
    %cst_39 = arith.constant dense<0.000000e+00> : vector<8x48xf32>
    %31 = tpu.matmul %27, %5, %cst_39 {dimension_numbers = #tpu.dot_dimension_numbers<[1], [0], [0], [1], [0, 0, 1, 1], [], []>} : vector<8x8xf32>, vector<8x48xf32>, vector<8x48xf32> -> vector<8x48xf32>
    %32 = vector.broadcast %17 : vector<1x48xf32> to vector<8x48xf32>
    %33 = arith.addf %31, %32 : vector<8x48xf32>
    %cst_40 = arith.constant dense<0.000000e+00> : vector<8x48xf32>
    %34 = tpu.matmul %27, %7, %cst_40 {dimension_numbers = #tpu.dot_dimension_numbers<[1], [0], [0], [1], [0, 0, 1, 1], [], []>} : vector<8x8xf32>, vector<8x48xf32>, vector<8x48xf32> -> vector<8x48xf32>
    %35 = vector.broadcast %19 : vector<1x48xf32> to vector<8x48xf32>
    %36 = arith.addf %34, %35 : vector<8x48xf32>
    %cst_41 = arith.constant dense<0.000000e+00> : vector<8x48xf32>
    %37 = tpu.matmul %1, %9, %cst_41 {dimension_numbers = #tpu.dot_dimension_numbers<[1], [0], [0], [1], [0, 0, 1, 1], [], []>} : vector<8x48xf32>, vector<48x48xf32>, vector<8x48xf32> -> vector<8x48xf32>
    %38 = vector.broadcast %21 : vector<1x48xf32> to vector<8x48xf32>
    %39 = arith.addf %37, %38 : vector<8x48xf32>
    %cst_42 = arith.constant dense<0.000000e+00> : vector<8x48xf32>
    %40 = tpu.matmul %1, %11, %cst_42 {dimension_numbers = #tpu.dot_dimension_numbers<[1], [0], [0], [1], [0, 0, 1, 1], [], []>} : vector<8x48xf32>, vector<48x48xf32>, vector<8x48xf32> -> vector<8x48xf32>
    %41 = vector.broadcast %23 : vector<1x48xf32> to vector<8x48xf32>
    %42 = arith.addf %40, %41 : vector<8x48xf32>
    %cst_43 = arith.constant dense<0.000000e+00> : vector<8x48xf32>
    %43 = tpu.matmul %1, %13, %cst_43 {dimension_numbers = #tpu.dot_dimension_numbers<[1], [0], [0], [1], [0, 0, 1, 1], [], []>} : vector<8x48xf32>, vector<48x48xf32>, vector<8x48xf32> -> vector<8x48xf32>
    %44 = vector.broadcast %25 : vector<1x48xf32> to vector<8x48xf32>
    %45 = arith.addf %43, %44 : vector<8x48xf32>
    %46 = arith.addf %30, %39 : vector<8x48xf32>
    %47 = arith.negf %46 : vector<8x48xf32>
    %48 = math.exp %47 : vector<8x48xf32>
    %cst_44 = arith.constant 1.000000e+00 : f32
    %49 = vector.broadcast %cst_44 : f32 to vector<8x48xf32>
    %50 = arith.addf %49, %48 : vector<8x48xf32>
    %51 = arith.divf %49, %50 : vector<8x48xf32>
    %52 = arith.addf %33, %42 : vector<8x48xf32>
    %53 = arith.negf %52 : vector<8x48xf32>
    %54 = math.exp %53 : vector<8x48xf32>
    %cst_45 = arith.constant 1.000000e+00 : f32
    %55 = vector.broadcast %cst_45 : f32 to vector<8x48xf32>
    %56 = arith.addf %55, %54 : vector<8x48xf32>
    %57 = arith.divf %55, %56 : vector<8x48xf32>
    %58 = arith.mulf %51, %45 : vector<8x48xf32>
    %59 = arith.addf %36, %58 : vector<8x48xf32>
    %60 = math.tanh %59 : vector<8x48xf32>
    %cst_46 = arith.constant 1.000000e+00 : f32
    %61 = vector.broadcast %cst_46 : f32 to vector<8x48xf32>
    %62 = arith.subf %61, %57 : vector<8x48xf32>
    %63 = arith.mulf %62, %60 : vector<8x48xf32>
    %64 = arith.mulf %57, %1 : vector<8x48xf32>
    %65 = arith.addf %63, %64 : vector<8x48xf32>
    %c1_47 = arith.constant 1 : index
    %c0_48 = arith.constant 0 : index
    %c0_49 = arith.constant 0 : index
    %66 = vector.load %arg0[%c1_47, %c0_48, %c0_49] : memref<8x8x8xf32, #tpu.memory_space<vmem>>, vector<1x8x8xf32>
    %67 = vector.shape_cast %66 : vector<1x8x8xf32> to vector<8x8xf32>
    %cst_50 = arith.constant dense<0.000000e+00> : vector<8x48xf32>
    %68 = tpu.matmul %67, %3, %cst_50 {dimension_numbers = #tpu.dot_dimension_numbers<[1], [0], [0], [1], [0, 0, 1, 1], [], []>} : vector<8x8xf32>, vector<8x48xf32>, vector<8x48xf32> -> vector<8x48xf32>
    %69 = vector.broadcast %15 : vector<1x48xf32> to vector<8x48xf32>
    %70 = arith.addf %68, %69 : vector<8x48xf32>
    %cst_51 = arith.constant dense<0.000000e+00> : vector<8x48xf32>
    %71 = tpu.matmul %67, %5, %cst_51 {dimension_numbers = #tpu.dot_dimension_numbers<[1], [0], [0], [1], [0, 0, 1, 1], [], []>} : vector<8x8xf32>, vector<8x48xf32>, vector<8x48xf32> -> vector<8x48xf32>
    %72 = vector.broadcast %17 : vector<1x48xf32> to vector<8x48xf32>
    %73 = arith.addf %71, %72 : vector<8x48xf32>
    %cst_52 = arith.constant dense<0.000000e+00> : vector<8x48xf32>
    %74 = tpu.matmul %67, %7, %cst_52 {dimension_numbers = #tpu.dot_dimension_numbers<[1], [0], [0], [1], [0, 0, 1, 1], [], []>} : vector<8x8xf32>, vector<8x48xf32>, vector<8x48xf32> -> vector<8x48xf32>
    %75 = vector.broadcast %19 : vector<1x48xf32> to vector<8x48xf32>
    %76 = arith.addf %74, %75 : vector<8x48xf32>
    %cst_53 = arith.constant dense<0.000000e+00> : vector<8x48xf32>
    %77 = tpu.matmul %65, %9, %cst_53 {dimension_numbers = #tpu.dot_dimension_numbers<[1], [0], [0], [1], [0, 0, 1, 1], [], []>} : vector<8x48xf32>, vector<48x48xf32>, vector<8x48xf32> -> vector<8x48xf32>
    %78 = vector.broadcast %21 : vector<1x48xf32> to vector<8x48xf32>
    %79 = arith.addf %77, %78 : vector<8x48xf32>
    %cst_54 = arith.constant dense<0.000000e+00> : vector<8x48xf32>
    %80 = tpu.matmul %65, %11, %cst_54 {dimension_numbers = #tpu.dot_dimension_numbers<[1], [0], [0], [1], [0, 0, 1, 1], [], []>} : vector<8x48xf32>, vector<48x48xf32>, vector<8x48xf32> -> vector<8x48xf32>
    %81 = vector.broadcast %23 : vector<1x48xf32> to vector<8x48xf32>
    %82 = arith.addf %80, %81 : vector<8x48xf32>
    %cst_55 = arith.constant dense<0.000000e+00> : vector<8x48xf32>
    %83 = tpu.matmul %65, %13, %cst_55 {dimension_numbers = #tpu.dot_dimension_numbers<[1], [0], [0], [1], [0, 0, 1, 1], [], []>} : vector<8x48xf32>, vector<48x48xf32>, vector<8x48xf32> -> vector<8x48xf32>
    %84 = vector.broadcast %25 : vector<1x48xf32> to vector<8x48xf32>
    %85 = arith.addf %83, %84 : vector<8x48xf32>
    %86 = arith.addf %70, %79 : vector<8x48xf32>
    %87 = arith.negf %86 : vector<8x48xf32>
    %88 = math.exp %87 : vector<8x48xf32>
    %cst_56 = arith.constant 1.000000e+00 : f32
    %89 = vector.broadcast %cst_56 : f32 to vector<8x48xf32>
    %90 = arith.addf %89, %88 : vector<8x48xf32>
    %91 = arith.divf %89, %90 : vector<8x48xf32>
    %92 = arith.addf %73, %82 : vector<8x48xf32>
    %93 = arith.negf %92 : vector<8x48xf32>
    %94 = math.exp %93 : vector<8x48xf32>
    %cst_57 = arith.constant 1.000000e+00 : f32
    %95 = vector.broadcast %cst_57 : f32 to vector<8x48xf32>
    %96 = arith.addf %95, %94 : vector<8x48xf32>
    %97 = arith.divf %95, %96 : vector<8x48xf32>
    %98 = arith.mulf %91, %85 : vector<8x48xf32>
    %99 = arith.addf %76, %98 : vector<8x48xf32>
    %100 = math.tanh %99 : vector<8x48xf32>
    %cst_58 = arith.constant 1.000000e+00 : f32
    %101 = vector.broadcast %cst_58 : f32 to vector<8x48xf32>
    %102 = arith.subf %101, %97 : vector<8x48xf32>
    %103 = arith.mulf %102, %100 : vector<8x48xf32>
    %104 = arith.mulf %97, %65 : vector<8x48xf32>
    %105 = arith.addf %103, %104 : vector<8x48xf32>
    %c2_59 = arith.constant 2 : index
    %c0_60 = arith.constant 0 : index
    %c0_61 = arith.constant 0 : index
    %106 = vector.load %arg0[%c2_59, %c0_60, %c0_61] : memref<8x8x8xf32, #tpu.memory_space<vmem>>, vector<1x8x8xf32>
    %107 = vector.shape_cast %106 : vector<1x8x8xf32> to vector<8x8xf32>
    %cst_62 = arith.constant dense<0.000000e+00> : vector<8x48xf32>
    %108 = tpu.matmul %107, %3, %cst_62 {dimension_numbers = #tpu.dot_dimension_numbers<[1], [0], [0], [1], [0, 0, 1, 1], [], []>} : vector<8x8xf32>, vector<8x48xf32>, vector<8x48xf32> -> vector<8x48xf32>
    %109 = vector.broadcast %15 : vector<1x48xf32> to vector<8x48xf32>
    %110 = arith.addf %108, %109 : vector<8x48xf32>
    %cst_63 = arith.constant dense<0.000000e+00> : vector<8x48xf32>
    %111 = tpu.matmul %107, %5, %cst_63 {dimension_numbers = #tpu.dot_dimension_numbers<[1], [0], [0], [1], [0, 0, 1, 1], [], []>} : vector<8x8xf32>, vector<8x48xf32>, vector<8x48xf32> -> vector<8x48xf32>
    %112 = vector.broadcast %17 : vector<1x48xf32> to vector<8x48xf32>
    %113 = arith.addf %111, %112 : vector<8x48xf32>
    %cst_64 = arith.constant dense<0.000000e+00> : vector<8x48xf32>
    %114 = tpu.matmul %107, %7, %cst_64 {dimension_numbers = #tpu.dot_dimension_numbers<[1], [0], [0], [1], [0, 0, 1, 1], [], []>} : vector<8x8xf32>, vector<8x48xf32>, vector<8x48xf32> -> vector<8x48xf32>
    %115 = vector.broadcast %19 : vector<1x48xf32> to vector<8x48xf32>
    %116 = arith.addf %114, %115 : vector<8x48xf32>
    %cst_65 = arith.constant dense<0.000000e+00> : vector<8x48xf32>
    %117 = tpu.matmul %105, %9, %cst_65 {dimension_numbers = #tpu.dot_dimension_numbers<[1], [0], [0], [1], [0, 0, 1, 1], [], []>} : vector<8x48xf32>, vector<48x48xf32>, vector<8x48xf32> -> vector<8x48xf32>
    %118 = vector.broadcast %21 : vector<1x48xf32> to vector<8x48xf32>
    %119 = arith.addf %117, %118 : vector<8x48xf32>
    %cst_66 = arith.constant dense<0.000000e+00> : vector<8x48xf32>
    %120 = tpu.matmul %105, %11, %cst_66 {dimension_numbers = #tpu.dot_dimension_numbers<[1], [0], [0], [1], [0, 0, 1, 1], [], []>} : vector<8x48xf32>, vector<48x48xf32>, vector<8x48xf32> -> vector<8x48xf32>
    %121 = vector.broadcast %23 : vector<1x48xf32> to vector<8x48xf32>
    %122 = arith.addf %120, %121 : vector<8x48xf32>
    %cst_67 = arith.constant dense<0.000000e+00> : vector<8x48xf32>
    %123 = tpu.matmul %105, %13, %cst_67 {dimension_numbers = #tpu.dot_dimension_numbers<[1], [0], [0], [1], [0, 0, 1, 1], [], []>} : vector<8x48xf32>, vector<48x48xf32>, vector<8x48xf32> -> vector<8x48xf32>
    %124 = vector.broadcast %25 : vector<1x48xf32> to vector<8x48xf32>
    %125 = arith.addf %123, %124 : vector<8x48xf32>
    %126 = arith.addf %110, %119 : vector<8x48xf32>
    %127 = arith.negf %126 : vector<8x48xf32>
    %128 = math.exp %127 : vector<8x48xf32>
    %cst_68 = arith.constant 1.000000e+00 : f32
    %129 = vector.broadcast %cst_68 : f32 to vector<8x48xf32>
    %130 = arith.addf %129, %128 : vector<8x48xf32>
    %131 = arith.divf %129, %130 : vector<8x48xf32>
    %132 = arith.addf %113, %122 : vector<8x48xf32>
    %133 = arith.negf %132 : vector<8x48xf32>
    %134 = math.exp %133 : vector<8x48xf32>
    %cst_69 = arith.constant 1.000000e+00 : f32
    %135 = vector.broadcast %cst_69 : f32 to vector<8x48xf32>
    %136 = arith.addf %135, %134 : vector<8x48xf32>
    %137 = arith.divf %135, %136 : vector<8x48xf32>
    %138 = arith.mulf %131, %125 : vector<8x48xf32>
    %139 = arith.addf %116, %138 : vector<8x48xf32>
    %140 = math.tanh %139 : vector<8x48xf32>
    %cst_70 = arith.constant 1.000000e+00 : f32
    %141 = vector.broadcast %cst_70 : f32 to vector<8x48xf32>
    %142 = arith.subf %141, %137 : vector<8x48xf32>
    %143 = arith.mulf %142, %140 : vector<8x48xf32>
    %144 = arith.mulf %137, %105 : vector<8x48xf32>
    %145 = arith.addf %143, %144 : vector<8x48xf32>
    %c3 = arith.constant 3 : index
    %c0_71 = arith.constant 0 : index
    %c0_72 = arith.constant 0 : index
    %146 = vector.load %arg0[%c3, %c0_71, %c0_72] : memref<8x8x8xf32, #tpu.memory_space<vmem>>, vector<1x8x8xf32>
    %147 = vector.shape_cast %146 : vector<1x8x8xf32> to vector<8x8xf32>
    %cst_73 = arith.constant dense<0.000000e+00> : vector<8x48xf32>
    %148 = tpu.matmul %147, %3, %cst_73 {dimension_numbers = #tpu.dot_dimension_numbers<[1], [0], [0], [1], [0, 0, 1, 1], [], []>} : vector<8x8xf32>, vector<8x48xf32>, vector<8x48xf32> -> vector<8x48xf32>
    %149 = vector.broadcast %15 : vector<1x48xf32> to vector<8x48xf32>
    %150 = arith.addf %148, %149 : vector<8x48xf32>
    %cst_74 = arith.constant dense<0.000000e+00> : vector<8x48xf32>
    %151 = tpu.matmul %147, %5, %cst_74 {dimension_numbers = #tpu.dot_dimension_numbers<[1], [0], [0], [1], [0, 0, 1, 1], [], []>} : vector<8x8xf32>, vector<8x48xf32>, vector<8x48xf32> -> vector<8x48xf32>
    %152 = vector.broadcast %17 : vector<1x48xf32> to vector<8x48xf32>
    %153 = arith.addf %151, %152 : vector<8x48xf32>
    %cst_75 = arith.constant dense<0.000000e+00> : vector<8x48xf32>
    %154 = tpu.matmul %147, %7, %cst_75 {dimension_numbers = #tpu.dot_dimension_numbers<[1], [0], [0], [1], [0, 0, 1, 1], [], []>} : vector<8x8xf32>, vector<8x48xf32>, vector<8x48xf32> -> vector<8x48xf32>
    %155 = vector.broadcast %19 : vector<1x48xf32> to vector<8x48xf32>
    %156 = arith.addf %154, %155 : vector<8x48xf32>
    %cst_76 = arith.constant dense<0.000000e+00> : vector<8x48xf32>
    %157 = tpu.matmul %145, %9, %cst_76 {dimension_numbers = #tpu.dot_dimension_numbers<[1], [0], [0], [1], [0, 0, 1, 1], [], []>} : vector<8x48xf32>, vector<48x48xf32>, vector<8x48xf32> -> vector<8x48xf32>
    %158 = vector.broadcast %21 : vector<1x48xf32> to vector<8x48xf32>
    %159 = arith.addf %157, %158 : vector<8x48xf32>
    %cst_77 = arith.constant dense<0.000000e+00> : vector<8x48xf32>
    %160 = tpu.matmul %145, %11, %cst_77 {dimension_numbers = #tpu.dot_dimension_numbers<[1], [0], [0], [1], [0, 0, 1, 1], [], []>} : vector<8x48xf32>, vector<48x48xf32>, vector<8x48xf32> -> vector<8x48xf32>
    %161 = vector.broadcast %23 : vector<1x48xf32> to vector<8x48xf32>
    %162 = arith.addf %160, %161 : vector<8x48xf32>
    %cst_78 = arith.constant dense<0.000000e+00> : vector<8x48xf32>
    %163 = tpu.matmul %145, %13, %cst_78 {dimension_numbers = #tpu.dot_dimension_numbers<[1], [0], [0], [1], [0, 0, 1, 1], [], []>} : vector<8x48xf32>, vector<48x48xf32>, vector<8x48xf32> -> vector<8x48xf32>
    %164 = vector.broadcast %25 : vector<1x48xf32> to vector<8x48xf32>
    %165 = arith.addf %163, %164 : vector<8x48xf32>
    %166 = arith.addf %150, %159 : vector<8x48xf32>
    %167 = arith.negf %166 : vector<8x48xf32>
    %168 = math.exp %167 : vector<8x48xf32>
    %cst_79 = arith.constant 1.000000e+00 : f32
    %169 = vector.broadcast %cst_79 : f32 to vector<8x48xf32>
    %170 = arith.addf %169, %168 : vector<8x48xf32>
    %171 = arith.divf %169, %170 : vector<8x48xf32>
    %172 = arith.addf %153, %162 : vector<8x48xf32>
    %173 = arith.negf %172 : vector<8x48xf32>
    %174 = math.exp %173 : vector<8x48xf32>
    %cst_80 = arith.constant 1.000000e+00 : f32
    %175 = vector.broadcast %cst_80 : f32 to vector<8x48xf32>
    %176 = arith.addf %175, %174 : vector<8x48xf32>
    %177 = arith.divf %175, %176 : vector<8x48xf32>
    %178 = arith.mulf %171, %165 : vector<8x48xf32>
    %179 = arith.addf %156, %178 : vector<8x48xf32>
    %180 = math.tanh %179 : vector<8x48xf32>
    %cst_81 = arith.constant 1.000000e+00 : f32
    %181 = vector.broadcast %cst_81 : f32 to vector<8x48xf32>
    %182 = arith.subf %181, %177 : vector<8x48xf32>
    %183 = arith.mulf %182, %180 : vector<8x48xf32>
    %184 = arith.mulf %177, %145 : vector<8x48xf32>
    %185 = arith.addf %183, %184 : vector<8x48xf32>
    %c4 = arith.constant 4 : index
    %c0_82 = arith.constant 0 : index
    %c0_83 = arith.constant 0 : index
    %186 = vector.load %arg0[%c4, %c0_82, %c0_83] : memref<8x8x8xf32, #tpu.memory_space<vmem>>, vector<1x8x8xf32>
    %187 = vector.shape_cast %186 : vector<1x8x8xf32> to vector<8x8xf32>
    %cst_84 = arith.constant dense<0.000000e+00> : vector<8x48xf32>
    %188 = tpu.matmul %187, %3, %cst_84 {dimension_numbers = #tpu.dot_dimension_numbers<[1], [0], [0], [1], [0, 0, 1, 1], [], []>} : vector<8x8xf32>, vector<8x48xf32>, vector<8x48xf32> -> vector<8x48xf32>
    %189 = vector.broadcast %15 : vector<1x48xf32> to vector<8x48xf32>
    %190 = arith.addf %188, %189 : vector<8x48xf32>
    %cst_85 = arith.constant dense<0.000000e+00> : vector<8x48xf32>
    %191 = tpu.matmul %187, %5, %cst_85 {dimension_numbers = #tpu.dot_dimension_numbers<[1], [0], [0], [1], [0, 0, 1, 1], [], []>} : vector<8x8xf32>, vector<8x48xf32>, vector<8x48xf32> -> vector<8x48xf32>
    %192 = vector.broadcast %17 : vector<1x48xf32> to vector<8x48xf32>
    %193 = arith.addf %191, %192 : vector<8x48xf32>
    %cst_86 = arith.constant dense<0.000000e+00> : vector<8x48xf32>
    %194 = tpu.matmul %187, %7, %cst_86 {dimension_numbers = #tpu.dot_dimension_numbers<[1], [0], [0], [1], [0, 0, 1, 1], [], []>} : vector<8x8xf32>, vector<8x48xf32>, vector<8x48xf32> -> vector<8x48xf32>
    %195 = vector.broadcast %19 : vector<1x48xf32> to vector<8x48xf32>
    %196 = arith.addf %194, %195 : vector<8x48xf32>
    %cst_87 = arith.constant dense<0.000000e+00> : vector<8x48xf32>
    %197 = tpu.matmul %185, %9, %cst_87 {dimension_numbers = #tpu.dot_dimension_numbers<[1], [0], [0], [1], [0, 0, 1, 1], [], []>} : vector<8x48xf32>, vector<48x48xf32>, vector<8x48xf32> -> vector<8x48xf32>
    %198 = vector.broadcast %21 : vector<1x48xf32> to vector<8x48xf32>
    %199 = arith.addf %197, %198 : vector<8x48xf32>
    %cst_88 = arith.constant dense<0.000000e+00> : vector<8x48xf32>
    %200 = tpu.matmul %185, %11, %cst_88 {dimension_numbers = #tpu.dot_dimension_numbers<[1], [0], [0], [1], [0, 0, 1, 1], [], []>} : vector<8x48xf32>, vector<48x48xf32>, vector<8x48xf32> -> vector<8x48xf32>
    %201 = vector.broadcast %23 : vector<1x48xf32> to vector<8x48xf32>
    %202 = arith.addf %200, %201 : vector<8x48xf32>
    %cst_89 = arith.constant dense<0.000000e+00> : vector<8x48xf32>
    %203 = tpu.matmul %185, %13, %cst_89 {dimension_numbers = #tpu.dot_dimension_numbers<[1], [0], [0], [1], [0, 0, 1, 1], [], []>} : vector<8x48xf32>, vector<48x48xf32>, vector<8x48xf32> -> vector<8x48xf32>
    %204 = vector.broadcast %25 : vector<1x48xf32> to vector<8x48xf32>
    %205 = arith.addf %203, %204 : vector<8x48xf32>
    %206 = arith.addf %190, %199 : vector<8x48xf32>
    %207 = arith.negf %206 : vector<8x48xf32>
    %208 = math.exp %207 : vector<8x48xf32>
    %cst_90 = arith.constant 1.000000e+00 : f32
    %209 = vector.broadcast %cst_90 : f32 to vector<8x48xf32>
    %210 = arith.addf %209, %208 : vector<8x48xf32>
    %211 = arith.divf %209, %210 : vector<8x48xf32>
    %212 = arith.addf %193, %202 : vector<8x48xf32>
    %213 = arith.negf %212 : vector<8x48xf32>
    %214 = math.exp %213 : vector<8x48xf32>
    %cst_91 = arith.constant 1.000000e+00 : f32
    %215 = vector.broadcast %cst_91 : f32 to vector<8x48xf32>
    %216 = arith.addf %215, %214 : vector<8x48xf32>
    %217 = arith.divf %215, %216 : vector<8x48xf32>
    %218 = arith.mulf %211, %205 : vector<8x48xf32>
    %219 = arith.addf %196, %218 : vector<8x48xf32>
    %220 = math.tanh %219 : vector<8x48xf32>
    %cst_92 = arith.constant 1.000000e+00 : f32
    %221 = vector.broadcast %cst_92 : f32 to vector<8x48xf32>
    %222 = arith.subf %221, %217 : vector<8x48xf32>
    %223 = arith.mulf %222, %220 : vector<8x48xf32>
    %224 = arith.mulf %217, %185 : vector<8x48xf32>
    %225 = arith.addf %223, %224 : vector<8x48xf32>
    %c5 = arith.constant 5 : index
    %c0_93 = arith.constant 0 : index
    %c0_94 = arith.constant 0 : index
    %226 = vector.load %arg0[%c5, %c0_93, %c0_94] : memref<8x8x8xf32, #tpu.memory_space<vmem>>, vector<1x8x8xf32>
    %227 = vector.shape_cast %226 : vector<1x8x8xf32> to vector<8x8xf32>
    %cst_95 = arith.constant dense<0.000000e+00> : vector<8x48xf32>
    %228 = tpu.matmul %227, %3, %cst_95 {dimension_numbers = #tpu.dot_dimension_numbers<[1], [0], [0], [1], [0, 0, 1, 1], [], []>} : vector<8x8xf32>, vector<8x48xf32>, vector<8x48xf32> -> vector<8x48xf32>
    %229 = vector.broadcast %15 : vector<1x48xf32> to vector<8x48xf32>
    %230 = arith.addf %228, %229 : vector<8x48xf32>
    %cst_96 = arith.constant dense<0.000000e+00> : vector<8x48xf32>
    %231 = tpu.matmul %227, %5, %cst_96 {dimension_numbers = #tpu.dot_dimension_numbers<[1], [0], [0], [1], [0, 0, 1, 1], [], []>} : vector<8x8xf32>, vector<8x48xf32>, vector<8x48xf32> -> vector<8x48xf32>
    %232 = vector.broadcast %17 : vector<1x48xf32> to vector<8x48xf32>
    %233 = arith.addf %231, %232 : vector<8x48xf32>
    %cst_97 = arith.constant dense<0.000000e+00> : vector<8x48xf32>
    %234 = tpu.matmul %227, %7, %cst_97 {dimension_numbers = #tpu.dot_dimension_numbers<[1], [0], [0], [1], [0, 0, 1, 1], [], []>} : vector<8x8xf32>, vector<8x48xf32>, vector<8x48xf32> -> vector<8x48xf32>
    %235 = vector.broadcast %19 : vector<1x48xf32> to vector<8x48xf32>
    %236 = arith.addf %234, %235 : vector<8x48xf32>
    %cst_98 = arith.constant dense<0.000000e+00> : vector<8x48xf32>
    %237 = tpu.matmul %225, %9, %cst_98 {dimension_numbers = #tpu.dot_dimension_numbers<[1], [0], [0], [1], [0, 0, 1, 1], [], []>} : vector<8x48xf32>, vector<48x48xf32>, vector<8x48xf32> -> vector<8x48xf32>
    %238 = vector.broadcast %21 : vector<1x48xf32> to vector<8x48xf32>
    %239 = arith.addf %237, %238 : vector<8x48xf32>
    %cst_99 = arith.constant dense<0.000000e+00> : vector<8x48xf32>
    %240 = tpu.matmul %225, %11, %cst_99 {dimension_numbers = #tpu.dot_dimension_numbers<[1], [0], [0], [1], [0, 0, 1, 1], [], []>} : vector<8x48xf32>, vector<48x48xf32>, vector<8x48xf32> -> vector<8x48xf32>
    %241 = vector.broadcast %23 : vector<1x48xf32> to vector<8x48xf32>
    %242 = arith.addf %240, %241 : vector<8x48xf32>
    %cst_100 = arith.constant dense<0.000000e+00> : vector<8x48xf32>
    %243 = tpu.matmul %225, %13, %cst_100 {dimension_numbers = #tpu.dot_dimension_numbers<[1], [0], [0], [1], [0, 0, 1, 1], [], []>} : vector<8x48xf32>, vector<48x48xf32>, vector<8x48xf32> -> vector<8x48xf32>
    %244 = vector.broadcast %25 : vector<1x48xf32> to vector<8x48xf32>
    %245 = arith.addf %243, %244 : vector<8x48xf32>
    %246 = arith.addf %230, %239 : vector<8x48xf32>
    %247 = arith.negf %246 : vector<8x48xf32>
    %248 = math.exp %247 : vector<8x48xf32>
    %cst_101 = arith.constant 1.000000e+00 : f32
    %249 = vector.broadcast %cst_101 : f32 to vector<8x48xf32>
    %250 = arith.addf %249, %248 : vector<8x48xf32>
    %251 = arith.divf %249, %250 : vector<8x48xf32>
    %252 = arith.addf %233, %242 : vector<8x48xf32>
    %253 = arith.negf %252 : vector<8x48xf32>
    %254 = math.exp %253 : vector<8x48xf32>
    %cst_102 = arith.constant 1.000000e+00 : f32
    %255 = vector.broadcast %cst_102 : f32 to vector<8x48xf32>
    %256 = arith.addf %255, %254 : vector<8x48xf32>
    %257 = arith.divf %255, %256 : vector<8x48xf32>
    %258 = arith.mulf %251, %245 : vector<8x48xf32>
    %259 = arith.addf %236, %258 : vector<8x48xf32>
    %260 = math.tanh %259 : vector<8x48xf32>
    %cst_103 = arith.constant 1.000000e+00 : f32
    %261 = vector.broadcast %cst_103 : f32 to vector<8x48xf32>
    %262 = arith.subf %261, %257 : vector<8x48xf32>
    %263 = arith.mulf %262, %260 : vector<8x48xf32>
    %264 = arith.mulf %257, %225 : vector<8x48xf32>
    %265 = arith.addf %263, %264 : vector<8x48xf32>
    %c6 = arith.constant 6 : index
    %c0_104 = arith.constant 0 : index
    %c0_105 = arith.constant 0 : index
    %266 = vector.load %arg0[%c6, %c0_104, %c0_105] : memref<8x8x8xf32, #tpu.memory_space<vmem>>, vector<1x8x8xf32>
    %267 = vector.shape_cast %266 : vector<1x8x8xf32> to vector<8x8xf32>
    %cst_106 = arith.constant dense<0.000000e+00> : vector<8x48xf32>
    %268 = tpu.matmul %267, %3, %cst_106 {dimension_numbers = #tpu.dot_dimension_numbers<[1], [0], [0], [1], [0, 0, 1, 1], [], []>} : vector<8x8xf32>, vector<8x48xf32>, vector<8x48xf32> -> vector<8x48xf32>
    %269 = vector.broadcast %15 : vector<1x48xf32> to vector<8x48xf32>
    %270 = arith.addf %268, %269 : vector<8x48xf32>
    %cst_107 = arith.constant dense<0.000000e+00> : vector<8x48xf32>
    %271 = tpu.matmul %267, %5, %cst_107 {dimension_numbers = #tpu.dot_dimension_numbers<[1], [0], [0], [1], [0, 0, 1, 1], [], []>} : vector<8x8xf32>, vector<8x48xf32>, vector<8x48xf32> -> vector<8x48xf32>
    %272 = vector.broadcast %17 : vector<1x48xf32> to vector<8x48xf32>
    %273 = arith.addf %271, %272 : vector<8x48xf32>
    %cst_108 = arith.constant dense<0.000000e+00> : vector<8x48xf32>
    %274 = tpu.matmul %267, %7, %cst_108 {dimension_numbers = #tpu.dot_dimension_numbers<[1], [0], [0], [1], [0, 0, 1, 1], [], []>} : vector<8x8xf32>, vector<8x48xf32>, vector<8x48xf32> -> vector<8x48xf32>
    %275 = vector.broadcast %19 : vector<1x48xf32> to vector<8x48xf32>
    %276 = arith.addf %274, %275 : vector<8x48xf32>
    %cst_109 = arith.constant dense<0.000000e+00> : vector<8x48xf32>
    %277 = tpu.matmul %265, %9, %cst_109 {dimension_numbers = #tpu.dot_dimension_numbers<[1], [0], [0], [1], [0, 0, 1, 1], [], []>} : vector<8x48xf32>, vector<48x48xf32>, vector<8x48xf32> -> vector<8x48xf32>
    %278 = vector.broadcast %21 : vector<1x48xf32> to vector<8x48xf32>
    %279 = arith.addf %277, %278 : vector<8x48xf32>
    %cst_110 = arith.constant dense<0.000000e+00> : vector<8x48xf32>
    %280 = tpu.matmul %265, %11, %cst_110 {dimension_numbers = #tpu.dot_dimension_numbers<[1], [0], [0], [1], [0, 0, 1, 1], [], []>} : vector<8x48xf32>, vector<48x48xf32>, vector<8x48xf32> -> vector<8x48xf32>
    %281 = vector.broadcast %23 : vector<1x48xf32> to vector<8x48xf32>
    %282 = arith.addf %280, %281 : vector<8x48xf32>
    %cst_111 = arith.constant dense<0.000000e+00> : vector<8x48xf32>
    %283 = tpu.matmul %265, %13, %cst_111 {dimension_numbers = #tpu.dot_dimension_numbers<[1], [0], [0], [1], [0, 0, 1, 1], [], []>} : vector<8x48xf32>, vector<48x48xf32>, vector<8x48xf32> -> vector<8x48xf32>
    %284 = vector.broadcast %25 : vector<1x48xf32> to vector<8x48xf32>
    %285 = arith.addf %283, %284 : vector<8x48xf32>
    %286 = arith.addf %270, %279 : vector<8x48xf32>
    %287 = arith.negf %286 : vector<8x48xf32>
    %288 = math.exp %287 : vector<8x48xf32>
    %cst_112 = arith.constant 1.000000e+00 : f32
    %289 = vector.broadcast %cst_112 : f32 to vector<8x48xf32>
    %290 = arith.addf %289, %288 : vector<8x48xf32>
    %291 = arith.divf %289, %290 : vector<8x48xf32>
    %292 = arith.addf %273, %282 : vector<8x48xf32>
    %293 = arith.negf %292 : vector<8x48xf32>
    %294 = math.exp %293 : vector<8x48xf32>
    %cst_113 = arith.constant 1.000000e+00 : f32
    %295 = vector.broadcast %cst_113 : f32 to vector<8x48xf32>
    %296 = arith.addf %295, %294 : vector<8x48xf32>
    %297 = arith.divf %295, %296 : vector<8x48xf32>
    %298 = arith.mulf %291, %285 : vector<8x48xf32>
    %299 = arith.addf %276, %298 : vector<8x48xf32>
    %300 = math.tanh %299 : vector<8x48xf32>
    %cst_114 = arith.constant 1.000000e+00 : f32
    %301 = vector.broadcast %cst_114 : f32 to vector<8x48xf32>
    %302 = arith.subf %301, %297 : vector<8x48xf32>
    %303 = arith.mulf %302, %300 : vector<8x48xf32>
    %304 = arith.mulf %297, %265 : vector<8x48xf32>
    %305 = arith.addf %303, %304 : vector<8x48xf32>
    %c7 = arith.constant 7 : index
    %c0_115 = arith.constant 0 : index
    %c0_116 = arith.constant 0 : index
    %306 = vector.load %arg0[%c7, %c0_115, %c0_116] : memref<8x8x8xf32, #tpu.memory_space<vmem>>, vector<1x8x8xf32>
    %307 = vector.shape_cast %306 : vector<1x8x8xf32> to vector<8x8xf32>
    %cst_117 = arith.constant dense<0.000000e+00> : vector<8x48xf32>
    %308 = tpu.matmul %307, %3, %cst_117 {dimension_numbers = #tpu.dot_dimension_numbers<[1], [0], [0], [1], [0, 0, 1, 1], [], []>} : vector<8x8xf32>, vector<8x48xf32>, vector<8x48xf32> -> vector<8x48xf32>
    %309 = vector.broadcast %15 : vector<1x48xf32> to vector<8x48xf32>
    %310 = arith.addf %308, %309 : vector<8x48xf32>
    %cst_118 = arith.constant dense<0.000000e+00> : vector<8x48xf32>
    %311 = tpu.matmul %307, %5, %cst_118 {dimension_numbers = #tpu.dot_dimension_numbers<[1], [0], [0], [1], [0, 0, 1, 1], [], []>} : vector<8x8xf32>, vector<8x48xf32>, vector<8x48xf32> -> vector<8x48xf32>
    %312 = vector.broadcast %17 : vector<1x48xf32> to vector<8x48xf32>
    %313 = arith.addf %311, %312 : vector<8x48xf32>
    %cst_119 = arith.constant dense<0.000000e+00> : vector<8x48xf32>
    %314 = tpu.matmul %307, %7, %cst_119 {dimension_numbers = #tpu.dot_dimension_numbers<[1], [0], [0], [1], [0, 0, 1, 1], [], []>} : vector<8x8xf32>, vector<8x48xf32>, vector<8x48xf32> -> vector<8x48xf32>
    %315 = vector.broadcast %19 : vector<1x48xf32> to vector<8x48xf32>
    %316 = arith.addf %314, %315 : vector<8x48xf32>
    %cst_120 = arith.constant dense<0.000000e+00> : vector<8x48xf32>
    %317 = tpu.matmul %305, %9, %cst_120 {dimension_numbers = #tpu.dot_dimension_numbers<[1], [0], [0], [1], [0, 0, 1, 1], [], []>} : vector<8x48xf32>, vector<48x48xf32>, vector<8x48xf32> -> vector<8x48xf32>
    %318 = vector.broadcast %21 : vector<1x48xf32> to vector<8x48xf32>
    %319 = arith.addf %317, %318 : vector<8x48xf32>
    %cst_121 = arith.constant dense<0.000000e+00> : vector<8x48xf32>
    %320 = tpu.matmul %305, %11, %cst_121 {dimension_numbers = #tpu.dot_dimension_numbers<[1], [0], [0], [1], [0, 0, 1, 1], [], []>} : vector<8x48xf32>, vector<48x48xf32>, vector<8x48xf32> -> vector<8x48xf32>
    %321 = vector.broadcast %23 : vector<1x48xf32> to vector<8x48xf32>
    %322 = arith.addf %320, %321 : vector<8x48xf32>
    %cst_122 = arith.constant dense<0.000000e+00> : vector<8x48xf32>
    %323 = tpu.matmul %305, %13, %cst_122 {dimension_numbers = #tpu.dot_dimension_numbers<[1], [0], [0], [1], [0, 0, 1, 1], [], []>} : vector<8x48xf32>, vector<48x48xf32>, vector<8x48xf32> -> vector<8x48xf32>
    %324 = vector.broadcast %25 : vector<1x48xf32> to vector<8x48xf32>
    %325 = arith.addf %323, %324 : vector<8x48xf32>
    %326 = arith.addf %310, %319 : vector<8x48xf32>
    %327 = arith.negf %326 : vector<8x48xf32>
    %328 = math.exp %327 : vector<8x48xf32>
    %cst_123 = arith.constant 1.000000e+00 : f32
    %329 = vector.broadcast %cst_123 : f32 to vector<8x48xf32>
    %330 = arith.addf %329, %328 : vector<8x48xf32>
    %331 = arith.divf %329, %330 : vector<8x48xf32>
    %332 = arith.addf %313, %322 : vector<8x48xf32>
    %333 = arith.negf %332 : vector<8x48xf32>
    %334 = math.exp %333 : vector<8x48xf32>
    %cst_124 = arith.constant 1.000000e+00 : f32
    %335 = vector.broadcast %cst_124 : f32 to vector<8x48xf32>
    %336 = arith.addf %335, %334 : vector<8x48xf32>
    %337 = arith.divf %335, %336 : vector<8x48xf32>
    %338 = arith.mulf %331, %325 : vector<8x48xf32>
    %339 = arith.addf %316, %338 : vector<8x48xf32>
    %340 = math.tanh %339 : vector<8x48xf32>
    %cst_125 = arith.constant 1.000000e+00 : f32
    %341 = vector.broadcast %cst_125 : f32 to vector<8x48xf32>
    %342 = arith.subf %341, %337 : vector<8x48xf32>
    %343 = arith.mulf %342, %340 : vector<8x48xf32>
    %344 = arith.mulf %337, %305 : vector<8x48xf32>
    %345 = arith.addf %343, %344 : vector<8x48xf32>
    %c0_126 = arith.constant 0 : index
    %c0_127 = arith.constant 0 : index
    %346 = vector.load %arg6[%c0_126, %c0_127] : memref<48x12xf32, #tpu.memory_space<vmem>>, vector<48x12xf32>
    %cst_128 = arith.constant dense<0.000000e+00> : vector<8x12xf32>
    %347 = tpu.matmul %65, %346, %cst_128 {dimension_numbers = #tpu.dot_dimension_numbers<[1], [0], [0], [1], [0, 0, 1, 1], [], []>} : vector<8x48xf32>, vector<48x12xf32>, vector<8x12xf32> -> vector<8x12xf32>
    %c0_129 = arith.constant 0 : index
    %c0_130 = arith.constant 0 : index
    %348 = vector.load %arg7[%c0_129, %c0_130] : memref<1x12xf32, #tpu.memory_space<vmem>>, vector<1x12xf32>
    %349 = vector.broadcast %348 : vector<1x12xf32> to vector<8x12xf32>
    %350 = arith.addf %347, %349 : vector<8x12xf32>
    %cst_131 = arith.constant 0.000000e+00 : f32
    %351 = vector.broadcast %cst_131 : f32 to vector<8x12xf32>
    %352 = arith.cmpf oge, %350, %351 : vector<8x12xf32>
    %cst_132 = arith.constant 0.00999999977 : f32
    %353 = vector.broadcast %cst_132 : f32 to vector<8x12xf32>
    %354 = arith.mulf %353, %350 : vector<8x12xf32>
    %355 = arith.select %352, %350, %354 : vector<8x12xi1>, vector<8x12xf32>
    %c0_133 = arith.constant 0 : index
    %c0_134 = arith.constant 0 : index
    %356 = vector.load %arg8[%c0_133, %c0_134] : memref<12x4xf32, #tpu.memory_space<vmem>>, vector<12x4xf32>
    %cst_135 = arith.constant dense<0.000000e+00> : vector<8x4xf32>
    %357 = tpu.matmul %355, %356, %cst_135 {dimension_numbers = #tpu.dot_dimension_numbers<[1], [0], [0], [1], [0, 0, 1, 1], [], []>} : vector<8x12xf32>, vector<12x4xf32>, vector<8x4xf32> -> vector<8x4xf32>
    %c0_136 = arith.constant 0 : index
    %c0_137 = arith.constant 0 : index
    %358 = vector.load %arg9[%c0_136, %c0_137] : memref<1x4xf32, #tpu.memory_space<vmem>>, vector<1x4xf32>
    %359 = vector.broadcast %358 : vector<1x4xf32> to vector<8x4xf32>
    %360 = arith.addf %357, %359 : vector<8x4xf32>
    %cst_138 = arith.constant dense<0xFF800000> : vector<8xf32>
    %361 = vector.multi_reduction <maximumf>, %360, %cst_138 [1] : vector<8x4xf32> to vector<8xf32>
    %362 = vector.shape_cast %361 : vector<8xf32> to vector<8x1xf32>
    %363 = vector.broadcast %362 : vector<8x1xf32> to vector<8x4xf32>
    %364 = arith.subf %360, %363 : vector<8x4xf32>
    %365 = math.exp %364 : vector<8x4xf32>
    %cst_139 = arith.constant dense<0.000000e+00> : vector<8xf32>
    %366 = vector.multi_reduction <add>, %365, %cst_139 [1] : vector<8x4xf32> to vector<8xf32>
    %367 = vector.shape_cast %366 : vector<8xf32> to vector<8x1xf32>
    %368 = tpu.reciprocal %367 {approx = true} : vector<8x1xf32> -> vector<8x1xf32>
    %369 = vector.broadcast %368 : vector<8x1xf32> to vector<8x4xf32>
    %370 = arith.mulf %365, %369 : vector<8x4xf32>
    %c0_140 = arith.constant 0 : index
    %c0_141 = arith.constant 0 : index
    %c0_142 = arith.constant 0 : index
    %371 = vector.load %arg10[%c0_140, %c0_141, %c0_142] : memref<2x8x4xf32, #tpu.memory_space<vmem>>, vector<1x8x4xf32>
    %372 = vector.shape_cast %371 : vector<1x8x4xf32> to vector<8x4xf32>
    %373 = vector.shape_cast %360 : vector<8x4xf32> to vector<1x8x4xf32>
    tpu.vector_store %arg10[%c0_140, %c0_141, %c0_142], %373 {strides = array<i32>} : memref<2x8x4xf32, #tpu.memory_space<vmem>>, vector<1x8x4xf32>,
    %c1_143 = arith.constant 1 : index
    %c0_144 = arith.constant 0 : index
    %c0_145 = arith.constant 0 : index
    %374 = vector.load %arg10[%c1_143, %c0_144, %c0_145] : memref<2x8x4xf32, #tpu.memory_space<vmem>>, vector<1x8x4xf32>
    %375 = vector.shape_cast %374 : vector<1x8x4xf32> to vector<8x4xf32>
    %376 = vector.shape_cast %370 : vector<8x4xf32> to vector<1x8x4xf32>
    tpu.vector_store %arg10[%c1_143, %c0_144, %c0_145], %376 {strides = array<i32>} : memref<2x8x4xf32, #tpu.memory_space<vmem>>, vector<1x8x4xf32>,
    %c0_146 = arith.constant 0 : index
    %c0_147 = arith.constant 0 : index
    %c0_148 = arith.constant 0 : index
    %377 = vector.load %arg11[%c0_146, %c0_147, %c0_148] : memref<1x8x48xf32, #tpu.memory_space<vmem>>, vector<1x8x48xf32>
    %378 = vector.shape_cast %377 : vector<1x8x48xf32> to vector<8x48xf32>
    %379 = vector.shape_cast %345 : vector<8x48xf32> to vector<1x8x48xf32>
    tpu.vector_store %arg11[%c0_146, %c0_147, %c0_148], %379 {strides = array<i32>} : memref<1x8x48xf32, #tpu.memory_space<vmem>>, vector<1x8x48xf32>,
    return
  }
}

</mosaic_0001>

<bundles_post_ra>
// kernel: ac_net_forward.1
= control target key start
LH: loop header
LB: loop body
LE: loop exit
PB: predicated region body
PF: predicated region fallthrough
CT: control target
= control target key end

     0   :  { %17 = vsyncpa [#allocation3], 0  ;;  %s2415_s0 = inlined_call_operand.vmem [shape: f32[8,8,8], index: 0, kind: input, shape index: {}]   ;;  %s2416_s1 = inlined_call_operand.vmem [shape: f32[1,8,48], index: 1, kind: input, shape index: {}, may-alias: {1,11}]   ;;  %s2417_s2 = inlined_call_operand.hbm [shape: f32[3,8,48], index: 2, kind: input, shape index: {}]   ;;  %s2418_s3 = inlined_call_operand.hbm [shape: f32[3,48,48], index: 3, kind: input, shape index: {}]   ;;  %s2419_s4 = inlined_call_operand.vmem [shape: f32[3,1,48], index: 4, kind: input, shape index: {}]   ;;  %s2420_s5 = inlined_call_operand.vmem [shape: f32[3,1,48], index: 5, kind: input, shape index: {}]   ;;  %s2421_s6 = inlined_call_operand.vmem [shape: f32[48,12], index: 6, kind: input, shape index: {}]   ;;  %s2422_s7 = inlined_call_operand.vmem [shape: f32[1,12], index: 7, kind: input, shape index: {}]   ;;  %s2423_s8 = inlined_call_operand.vmem [shape: f32[12,4], index: 8, kind: input, shape index: {}]   ;;  %s2424_s9 = inlined_call_operand.vmem [shape: f32[1,4], index: 9, kind: input, shape index: {}]   ;;  %s2425_s10 = inlined_call_operand.vmem [shape: f32[2,8,4], index: 10, kind: output, shape index: {0}]   ;;  %s2426_s11 = inlined_call_operand.vmem [shape: f32[1,8,48], index: 11, kind: output, shape index: {1}, may-alias: {1,11}]  }
   0x1   :  { %s27_s19 = sshll.u32 %s2417_s2, 4  ;;  %s28_s19 = int_to_ptr.hbm [resolvable:$true] %s27_s19 }
   0x2   :  { %18 = vsyncpa [#allocation5], 0  ;;  %s1870_s20 = smov [#allocation2]   ;;  %s40_s24 = sshll.u32 %s2418_s3, 4  ;;  %s41_s24 = int_to_ptr.hbm [resolvable:$true] %s40_s24 }
   0x3   :  { %s29_s21 = sshll.u32 %s1870_s20, 4  ;;  %s1871_s25 = smov 128   ;;  %s30_s21 = int_to_ptr.vmem [resolvable:$true] %s29_s21 }
   0x4   :  { %s1872_s26 = smov 8   ;;  %s1873_s27 = smov [#allocation4]  }
   0x5   :  { %35 = dma.hbm_to_vmem [thread:$0]  %s28_s19, 384, %s30_s21, [#allocation3], %s1871_s25, %s1871_s25, %s1872_s26  }
   0x6   :  { %s42_s28 = sshll.u32 %s1873_s27, 4  ;;  %s43_s28 = int_to_ptr.vmem [resolvable:$true] %s42_s28 }
   0x7   :  { %48 = dma.hbm_to_vmem [thread:$0]  %s41_s24, 2304, %s43_s28, [#allocation5], %s1871_s25, %s1871_s25, %s1872_s26  }
   0x8   :  { %1866 = dma.done.wait [#allocation3], 384  }
   0x9   :  { %1867 = vsyncadd [#allocation3], 4294966912 }
   0xa   :  { %1868 = dma.done.wait [#allocation5], 2304  }
   0xb   :  { %1869 = vsyncadd [#allocation5], 4294964992  ;;  %v1940_v0 = vld [vmem:[#allocation4 + $0x28] sm:$0xff]  ;;  %v1944_v2 = vld [vmem:[#allocation4 + $0x20] sm:$0xff]  ;;  %vm109_vm0 = vcmask 64512   ;;  %vm182_vm1 = vcmask 392192  }
   0xc   :  { %v1942_v1 = vld [vmem:[#allocation2] sm:$0xff]  ;;  %196 = vmatpush.msra.mxu3 %v1940_v0  ;;  %v1948_v3 = vld [vmem:[#allocation4 + $0x58] sm:$0xff]  ;;  %v1950_v4 = vld [vmem:[#allocation4 + $0x50] sm:$0xff] }
   0xd   :  { %128 = vmatpush.msra.mxu0 %v1942_v1  ;;  %v1953_v5 = vld [vmem:[#allocation4 + $0x18] sm:$0xff]  ;;  %v105_v6 = vld [vmem:[%s2415_s0] sm:$0xff]  ;;  %v1963_v8 = vld [vmem:[#allocation4 + $0x10] sm:$0xff] }
   0xe   :  { %197 = vmatpush.msra.mxu3 %v1944_v2  ;;  %1621 = vmatmul.msk.f32.vlgmr.msra.gmra.mxu0 %vm109_vm0, %v105_v6  ;;  %v1960_v7 = vld [vmem:[#allocation4 + $0x48] sm:$0xff]  ;;  %v1965_v9 = vld [vmem:[#allocation2 + $0x8] sm:$0xff]  ;;  %v1970_v11 = vld [vmem:[#allocation4 + $0x40] sm:$0xff] }
   0xf   :  { %219 = vmatpush.msrb.mxu0 %v1948_v3  ;;  %v1968_v10 = vld [vmem:[#allocation4 + $0x8] sm:$0xff]  ;;  %151 = vmatpush.msra.mxu1 %v1965_v9  ;;  %v1976_v13 = vld [vmem:[#allocation4] sm:$0xff]  ;;  %v1978_v14 = vld [vmem:[#allocation4 + $0x38] sm:$0xff] }
  0x10   :  { %198 = vmatpush.msra.mxu3 %v1953_v5  ;;  %v1973_v12 = vld [vmem:[#allocation4 + $0x88] sm:$0xff]  ;;  %1622 = vmatmul.msk.f32.vlgmr.msra.gmra.mxu1 %vm109_vm0, %v105_v6  ;;  %v1981_v15 = vld [vmem:[#allocation4 + $0x80] sm:$0xff]  ;;  %v1983_v16 = vld [vmem:[#allocation2 + $0x10] sm:$0xff] }
  0x11   :  { %220 = vmatpush.msrb.mxu0 %v1950_v4  ;;  %v1989_v17 = vld [vmem:[%s2416_s1] sm:$0xff]  ;;  %v1991_v18 = vld [vmem:[#allocation4 + $0x30] sm:$0xff]  ;;  %242 = vmatpush.msrb.mxu1 %v1973_v12  ;;  %v1995_v19 = vld [vmem:[#allocation4 + $0x78] sm:$0xff] }
  0x12   :  { %199 = vmatpush.msra.mxu3 %v1963_v8  ;;  %174 = vmatpush.msra.mxu2 %v1983_v16  ;;  %v2001_v20 = vld [vmem:[#allocation4 + $0x70] sm:$0xff]  ;;  %v2009_v21 = vld [vmem:[#allocation4 + $0x68] sm:$0xff]  ;;  %v2014_v22 = vld [vmem:[#allocation4 + $0x60] sm:$0xff] }
  0x13   :  { %221 = vmatpush.msrb.mxu0 %v1960_v7  ;;  %243 = vmatpush.msrb.mxu1 %v1981_v15  ;;  %v2041_v24 = vld [vmem:[%s2419_s4 + $0x1] ss:$0 sm:$0xff]  ;;  %v2052_v28 = vld [vmem:[%s2419_s4] ss:$0 sm:$0xff]  ;;  %v1629_v34 = vld [vmem:[%s2415_s0 + $0x8] sm:$0xff] }
  0x14   :  { %200 = vmatpush.msra.mxu3 %v1968_v10  ;;  %1623 = vmatmul.msk.f32.vlgmr.msra.gmra.mxu2 %vm109_vm0, %v105_v6  ;;  %v2046_v26 = vld [vmem:[%s2420_s5 + $0x1] ss:$0 sm:$0xff]  ;;  %v2058_v31 = vld [vmem:[%s2420_s5] ss:$0 sm:$0xff]  ;;  %v2089_v49 = vld [vmem:[%s2420_s5 + $0x2] ss:$0 sm:$0xff] }
  0x15   :  { %222 = vmatpush.msrb.mxu0 %v1970_v11  ;;  %244 = vmatpush.msrb.mxu1 %v1995_v19  ;;  %v2094_v55 = vld [vmem:[%s2419_s4 + $0x2] ss:$0 sm:$0xff] }
  0x16   :  { %201 = vmatpush.msra.mxu3 %v1976_v13  ;;  %319 = vmatpush.msrb.mxu2 %v1942_v1 }
  0x17   :  { %223 = vmatpush.msrb.mxu0 %v1978_v14  ;;  %1624 = vmatmul.msk.f32.vlgmr.msra.gmra.mxu3 %vm182_vm1, %v1989_v17 }
  0x18   :  { %245 = vmatpush.msrb.mxu1 %v2001_v20  ;;  %339 = vmatpush.msra.mxu2 %v1965_v9 }
  0x19   :  { %224 = vmatpush.msrb.mxu0 %v1991_v18  ;;  %359 = vmatpush.msrb.mxu3 %v1983_v16 }
  0x1a   :  { %1625 = vmatmul.msk.f32.vlgmr.msrb.gmra.mxu0 %vm182_vm1, %v1989_v17  ;;  %246 = vmatpush.msrb.mxu1 %v2009_v21 }
  0x1b   :  { %377 = vmatpush.msra.mxu0 %v1940_v0  ;;  %494 = vmatpush.msra.mxu3 %v1942_v1 }
  0x1c   :  { %247 = vmatpush.msrb.mxu1 %v2014_v22  ;;  %1630 = vmatmul.msk.f32.vlgmr.msrb.gmra.mxu2 %vm109_vm0, %v1629_v34 }
  0x1d   :  { %378 = vmatpush.msra.mxu0 %v1944_v2  ;;  %1626 = vmatmul.msk.f32.vlgmr.msrb.gmra.mxu1 %vm182_vm1, %v1989_v17 }
  0x1e   :  { %397 = vmatpush.msra.mxu1 %v1948_v3  ;;  %417 = vmatpush.msrb.mxu2 %v1973_v12 }
  0x1f   :  { %379 = vmatpush.msra.mxu0 %v1953_v5  ;;  %1632 = vmatmul.msk.f32.vlgmr.msrb.gmra.mxu3 %vm109_vm0, %v1629_v34 }
  0x20   :  { %398 = vmatpush.msra.mxu1 %v1950_v4  ;;  %552 = vmatpush.msrb.mxu3 %v1940_v0 }
  0x21   :  { %380 = vmatpush.msra.mxu0 %v1963_v8  ;;  %418 = vmatpush.msrb.mxu2 %v1981_v15 }
  0x22   :  { %399 = vmatpush.msra.mxu1 %v1960_v7  ;;  %553 = vmatpush.msrb.mxu3 %v1944_v2 }
  0x23   :  { %381 = vmatpush.msra.mxu0 %v1968_v10  ;;  %419 = vmatpush.msrb.mxu2 %v1995_v19 }
  0x24   :  { %400 = vmatpush.msra.mxu1 %v1970_v11  ;;  %554 = vmatpush.msrb.mxu3 %v1953_v5 }
  0x25   :  { %382 = vmatpush.msra.mxu0 %v1976_v13  ;;  %420 = vmatpush.msrb.mxu2 %v2001_v20 }
  0x26   :  { %401 = vmatpush.msra.mxu1 %v1978_v14  ;;  %555 = vmatpush.msrb.mxu3 %v1963_v8 }
  0x27   :  { %514 = vmatpush.msrb.mxu0 %v1965_v9  ;;  %1631 = vmatmul.msk.f32.vlgmr.msra.gmra.mxu2 %vm109_vm0, %v1629_v34 }
  0x28   :  { %402 = vmatpush.msra.mxu1 %v1991_v18  ;;  %421 = vmatpush.msrb.mxu2 %v2009_v21 }
  0x29   :  { %556 = vmatpush.msrb.mxu3 %v1968_v10 }
  0x2a   :  { %534 = vmatpush.msrb.mxu1 %v1983_v16  ;;  %422 = vmatpush.msrb.mxu2 %v2014_v22 }
  0x2b   :  { %557 = vmatpush.msrb.mxu3 %v1976_v13 }
  0x2c   :  { %572 = vmatpush.msra.mxu2 %v1948_v3 }
  0x2e   :  { %573 = vmatpush.msra.mxu2 %v1950_v4 }
  0x30   :  { %574 = vmatpush.msra.mxu2 %v1960_v7 }
  0x32   :  { %575 = vmatpush.msra.mxu2 %v1970_v11 }
  0x34   :  { %576 = vmatpush.msra.mxu2 %v1978_v14 }
  0x36   :  { %577 = vmatpush.msra.mxu2 %v1991_v18 }
  0x8b   :  { %v130_v23 = vpop.f32.mrf.mxu0 }
  0x8c   :  { %v131_v33 = vadd.f32 %v2052_v28, %v130_v23 }
  0x8d   :  { %v153_v25 = vpop.f32.mrf.mxu1 }
  0x8e   :  { %v154_v27 = vadd.f32 %v2041_v24, %v153_v25 }
  0x97   :  { %v226_v29 = vpop.f32.mrf.mxu0  ;;  %v176_v57 = vpop.f32.mrf.mxu2 }
  0x98   :  { %v227_v30 = vadd.f32 %v2046_v26, %v226_v29  ;;  %v177_v63 = vadd.f32 %v2094_v55, %v176_v57 }
  0x9a   :  { %v272_v32 = vadd.f32 %v227_v30, %v154_v27  ;;  %v203_v36 = vpop.f32.mrf.mxu3  ;;  %v249_v51 = vpop.f32.mrf.mxu1 }
  0x9b   :  { %v204_v37 = vadd.f32 %v2058_v31, %v203_v36  ;;  %v250_v58 = vadd.f32 %v2089_v49, %v249_v51  ;;  %v1638_v51 = vld [vmem:[%s2415_s0 + $0x10] sm:$0xff] }
  0x9c   :  { %v1628_v35 = vmul.f32 -1.442695, %v272_v32  ;;  %1639 = vmatmul.msk.f32.vlgmr.msra.gmra.mxu3 %vm109_vm0, %v1638_v51 }
  0x9d   :  { %v252_v38 = vadd.f32 %v204_v37, %v131_v33  ;;  %689 = vmatpush.msra.mxu3 %v1965_v9 }
  0x9e   :  { %1708 = vpow2.f32 %v1628_v35 }
  0x9f   :  { %v1627_v39 = vmul.f32 -1.442695, %v252_v38 }
  0xa1   :  { %1710 = vpow2.f32 %v1627_v39 }
  0xa4   :  { %v1709_v40 = vpop.eup %1708 }
  0xa5   :  { %v276_v41 = vadd.f32 1.0, %v1709_v40 }
  0xa7   :  { %1712 = vrcp.f32 %v276_v41  ;;  %v1711_v42 = vpop.eup %1710  ;;  %vm282_vm4 = vweird.f32 %v276_v41  ;;  %v288_v61 = vand.u32 2147483648, %v276_v41  ;;  %v286_v25 = vand.u32 2147483647, %v276_v41 }
  0xa8   :  { %v256_v43 = vadd.f32 1.0, %v1711_v42 }
  0xa9   :  { %v289_v29 = vor.u32 1.1754944e-38, %v288_v61  ;;  %vm287_vm9 = vcmp.eq.f32.partialorder %v286_v25, 8.507059e+37 }
  0xaa   :  { %1714 = vrcp.f32 %v256_v43  ;;  %v268_v52 = vand.u32 2147483648, %v256_v43  ;;  %v266_v54 = vand.u32 2147483647, %v256_v43  ;;  %vm262_vm3 = vweird.f32 %v256_v43 }
  0xac   :  { %v269_v60 = vor.u32 1.1754944e-38, %v268_v52  ;;  %vm267_vm7 = vcmp.eq.f32.partialorder %v266_v54, 8.507059e+37 }
  0xad   :  { %v1713_v44 = vpop.eup %1712 }
  0xae   :  { %v278_v45 = vmul.f32 %v1713_v44, %v276_v41  ;;  %vm283_vm6 = vweird.f32 %v1713_v44 }
  0xaf   :  { %vm284_vm8 = vmor %vm282_vm4, %vm283_vm6 }
  0xb0   :  { %v1715_v46 = vpop.eup %1714  ;;  %v279_v48 = vsub.f32 1.0, %v278_v45 }
  0xb1   :  { %v258_v47 = vmul.f32 %v1715_v46, %v256_v43  ;;  %vm263_vm2 = vweird.f32 %v1715_v46 }
  0xb2   :  { %v280_v56 = vmul.f32 %v1713_v44, %v279_v48  ;;  %vm264_vm5 = vmor %vm262_vm3, %vm263_vm2 }
  0xb3   :  { %v259_v50 = vsub.f32 1.0, %v258_v47 }
  0xb4   :  { %v281_v23 = vadd.f32 %v1713_v44, %v280_v56 }
  0xb5   :  { %v260_v53 = vmul.f32 %v1715_v46, %v259_v50 }
  0xb6   :  { %v285_v32 = vsel %vm284_vm8, %v1713_v44, %v281_v23 }
  0xb7   :  { %v261_v59 = vadd.f32 %v1715_v46, %v260_v53  ;;  %v290_v33 = vsel %vm287_vm9, %v289_v29, %v285_v32  ;;  %v361_v29 = vpop.f32.mrf.mxu3 }
  0xb8   :  { %v295_v34 = vsub.f32 1.0, %v290_v33  ;;  %v297_v37 = vmul.f32 %v290_v33, %v1989_v17  ;;  %v321_v17 = vpop.f32.mrf.mxu2 }
  0xb9   :  { %v265_v62 = vsel %vm264_vm5, %v1715_v46, %v261_v59  ;;  %v322_v40 = vadd.f32 %v2052_v28, %v321_v17 }
  0xba   :  { %v270_v6 = vsel %vm267_vm7, %v269_v60, %v265_v62 }
  0xbb   :  { %v292_v27 = vmul.f32 %v270_v6, %v250_v58 }
  0xbd   :  { %v293_v30 = vadd.f32 %v292_v27, %v177_v63 }
  0xbf   :  { %1716 = vtanh.f32 %v293_v30 }
  0xc0   :  { %v341_v39 = vpop.f32.mrf.mxu2 }
  0xc1   :  { %v342_v41 = vadd.f32 %v2041_v24, %v341_v39 }
  0xc5   :  { %v1717_v35 = vpop.eup %1716 }
  0xc6   :  { %v296_v36 = vmul.f32 %v1717_v35, %v295_v34  ;;  %v362_v35 = vadd.f32 %v2094_v55, %v361_v29 }
  0xc8   :  { %v2099_v38 = vadd.f32 %v297_v37, %v296_v36 }
  0xca   :  { %1633 = vmatmul.msk.f32.vlgmr.msra.gmra.mxu0 %vm182_vm1, %v2099_v38  ;;  %1634 = vmatmul.msk.f32.vlgmr.msra.gmra.mxu1 %vm182_vm1, %v2099_v38 }
  0xcb   :  { %1635 = vmatmul.msk.f32.vlgmr.msrb.gmra.mxu2 %vm182_vm1, %v2099_v38  ;;  %592 = vmatpush.msra.mxu0 %v1973_v12 }
  0xcc   :  { %727 = vmatpush.msrb.mxu2 %v1940_v0  ;;  %669 = vmatpush.msra.mxu1 %v1942_v1 }
  0xcd   :  { %593 = vmatpush.msra.mxu0 %v1981_v15 }
  0xce   :  { %728 = vmatpush.msrb.mxu2 %v1944_v2 }
  0xcf   :  { %594 = vmatpush.msra.mxu0 %v1995_v19 }
  0xd0   :  { %729 = vmatpush.msrb.mxu2 %v1953_v5 }
  0xd1   :  { %595 = vmatpush.msra.mxu0 %v2001_v20 }
  0xd2   :  { %730 = vmatpush.msrb.mxu2 %v1963_v8  ;;  %1640 = vmatmul.msk.f32.vlgmr.msrb.gmra.mxu0 %vm109_vm0, %v1638_v51 }
  0xd3   :  { %596 = vmatpush.msra.mxu0 %v2009_v21  ;;  %1641 = vmatmul.msk.f32.vlgmr.msrb.gmra.mxu1 %vm109_vm0, %v1638_v51 }
  0xd4   :  { %731 = vmatpush.msrb.mxu2 %v1968_v10  ;;  %709 = vmatpush.msrb.mxu1 %v1983_v16 }
  0xd5   :  { %597 = vmatpush.msra.mxu0 %v2014_v22 }
  0xd6   :  { %732 = vmatpush.msrb.mxu2 %v1976_v13 }
  0xd7   :  { %747 = vmatpush.msrb.mxu0 %v1948_v3 }
  0xd9   :  { %748 = vmatpush.msrb.mxu0 %v1950_v4 }
  0xdb   :  { %749 = vmatpush.msrb.mxu0 %v1960_v7 }
  0xdd   :  { %750 = vmatpush.msrb.mxu0 %v1970_v11 }
  0xdf   :  { %751 = vmatpush.msrb.mxu0 %v1978_v14 }
  0xe1   :  { %752 = vmatpush.msrb.mxu0 %v1991_v18 }
 0x11f   :  { %v496_v51 = vpop.f32.mrf.mxu3 }
 0x147   :  { %v384_v42 = vpop.f32.mrf.mxu0  ;;  %v404_v43 = vpop.f32.mrf.mxu1 }
 0x148   :  { %v385_v44 = vadd.f32 %v2058_v31, %v384_v42  ;;  %v405_v45 = vadd.f32 %v2046_v26, %v404_v43 }
 0x14a   :  { %v427_v46 = vadd.f32 %v385_v44, %v322_v40  ;;  %v447_v47 = vadd.f32 %v405_v45, %v342_v41 }
 0x14c   :  { %v1636_v48 = vmul.f32 -1.442695, %v427_v46  ;;  %v1637_v50 = vmul.f32 -1.442695, %v447_v47 }
 0x14e   :  { %1718 = vpow2.f32 %v1636_v48  ;;  %v424_v27 = vpop.f32.mrf.mxu2 }
 0x14f   :  { %1720 = vpow2.f32 %v1637_v50  ;;  %v425_v33 = vadd.f32 %v2089_v49, %v424_v27 }
 0x154   :  { %v1719_v52 = vpop.eup %1718 }
 0x155   :  { %v1721_v53 = vpop.eup %1720  ;;  %v431_v54 = vadd.f32 1.0, %v1719_v52  ;;  %v516_v52 = vpop.f32.mrf.mxu0 }
 0x156   :  { %v451_v56 = vadd.f32 1.0, %v1721_v53  ;;  %v517_v53 = vadd.f32 %v2041_v24, %v516_v52 }
 0x157   :  { %1722 = vrcp.f32 %v431_v54  ;;  %v443_v63 = vand.u32 2147483648, %v431_v54  ;;  %v441_v23 = vand.u32 2147483647, %v431_v54  ;;  %vm437_vm11 = vweird.f32 %v431_v54 }
 0x158   :  { %1724 = vrcp.f32 %v451_v56  ;;  %v463_v17 = vand.u32 2147483648, %v451_v56  ;;  %vm457_vm15 = vweird.f32 %v451_v56  ;;  %v461_v40 = vand.u32 2147483647, %v451_v56 }
 0x159   :  { %v444_v32 = vor.u32 1.1754944e-38, %v443_v63  ;;  %vm442_vm13 = vcmp.eq.f32.partialorder %v441_v23, 8.507059e+37 }
 0x15a   :  { %v464_v43 = vor.u32 1.1754944e-38, %v463_v17  ;;  %vm462_vm3 = vcmp.eq.f32.partialorder %v461_v40, 8.507059e+37 }
 0x15d   :  { %v1723_v57 = vpop.eup %1722 }
 0x15e   :  { %v1725_v58 = vpop.eup %1724  ;;  %v433_v59 = vmul.f32 %v1723_v57, %v431_v54  ;;  %vm438_vm10 = vweird.f32 %v1723_v57 }
 0x15f   :  { %v453_v60 = vmul.f32 %v1725_v58, %v451_v56  ;;  %vm439_vm12 = vmor %vm437_vm11, %vm438_vm10  ;;  %vm458_vm14 = vweird.f32 %v1725_v58 }
 0x160   :  { %v434_v61 = vsub.f32 1.0, %v433_v59  ;;  %vm459_vm2 = vmor %vm457_vm15, %vm458_vm14 }
 0x161   :  { %v454_v62 = vsub.f32 1.0, %v453_v60 }
 0x162   :  { %v435_v6 = vmul.f32 %v1723_v57, %v434_v61 }
 0x163   :  { %v455_v25 = vmul.f32 %v1725_v58, %v454_v62 }
 0x164   :  { %v436_v30 = vadd.f32 %v1723_v57, %v435_v6  ;;  %v1647_v6 = vld [vmem:[%s2415_s0 + $0x18] sm:$0xff] }
 0x165   :  { %v456_v37 = vadd.f32 %v1725_v58, %v455_v25  ;;  %1648 = vmatmul.msk.f32.vlgmr.msra.gmra.mxu1 %vm109_vm0, %v1647_v6 }
 0x166   :  { %v440_v34 = vsel %vm439_vm12, %v1723_v57, %v436_v30  ;;  %v497_v57 = vadd.f32 %v2052_v28, %v496_v51  ;;  %844 = vmatpush.msra.mxu1 %v1942_v1 }
 0x167   :  { %v445_v36 = vsel %vm442_vm13, %v444_v32, %v440_v34  ;;  %v460_v42 = vsel %vm459_vm2, %v1725_v58, %v456_v37 }
 0x168   :  { %v467_v39 = vmul.f32 %v445_v36, %v425_v33  ;;  %v465_v44 = vsel %vm462_vm3, %v464_v43, %v460_v42  ;;  %v536_v42 = vpop.f32.mrf.mxu1 }
 0x169   :  { %v470_v45 = vsub.f32 1.0, %v465_v44  ;;  %v472_v48 = vmul.f32 %v465_v44, %v2099_v38 }
 0x16a   :  { %v468_v41 = vadd.f32 %v467_v39, %v362_v35 }
 0x16c   :  { %1726 = vtanh.f32 %v468_v41 }
 0x16d   :  { %1650 = vmatmul.msk.f32.vlgmr.msrb.gmra.mxu1 %vm109_vm0, %v1647_v6 }
 0x16e   :  { %902 = vmatpush.msrb.mxu1 %v1940_v0 }
 0x170   :  { %903 = vmatpush.msrb.mxu1 %v1944_v2 }
 0x172   :  { %v1727_v46 = vpop.eup %1726  ;;  %904 = vmatpush.msrb.mxu1 %v1953_v5 }
 0x173   :  { %v471_v47 = vmul.f32 %v1727_v46, %v470_v45  ;;  %v537_v46 = vadd.f32 %v2094_v55, %v536_v42 }
 0x174   :  { %905 = vmatpush.msrb.mxu1 %v1963_v8 }
 0x175   :  { %v2141_v50 = vadd.f32 %v472_v48, %v471_v47 }
 0x176   :  { %906 = vmatpush.msrb.mxu1 %v1968_v10 }
 0x177   :  { %1642 = vmatmul.msk.f32.vlgmr.msrb.gmra.mxu3 %vm182_vm1, %v2141_v50  ;;  %1643 = vmatmul.msk.f32.vlgmr.msra.gmra.mxu2 %vm182_vm1, %v2141_v50 }
 0x178   :  { %1644 = vmatmul.msk.f32.vlgmr.msra.gmra.mxu0 %vm182_vm1, %v2141_v50  ;;  %767 = vmatpush.msrb.mxu3 %v1973_v12 }
 0x179   :  { %864 = vmatpush.msra.mxu2 %v1965_v9  ;;  %884 = vmatpush.msra.mxu0 %v1983_v16 }
 0x17a   :  { %768 = vmatpush.msrb.mxu3 %v1981_v15  ;;  %907 = vmatpush.msrb.mxu1 %v1976_v13 }
 0x17c   :  { %769 = vmatpush.msrb.mxu3 %v1995_v19 }
 0x17e   :  { %770 = vmatpush.msrb.mxu3 %v2001_v20 }
 0x17f   :  { %1649 = vmatmul.msk.f32.vlgmr.msra.gmra.mxu3 %vm109_vm0, %v1647_v6 }
 0x180   :  { %771 = vmatpush.msrb.mxu3 %v2009_v21 }
 0x182   :  { %772 = vmatpush.msrb.mxu3 %v2014_v22 }
 0x184   :  { %922 = vmatpush.msra.mxu3 %v1948_v3 }
 0x186   :  { %923 = vmatpush.msra.mxu3 %v1950_v4 }
 0x188   :  { %924 = vmatpush.msra.mxu3 %v1960_v7 }
 0x18a   :  { %925 = vmatpush.msra.mxu3 %v1970_v11 }
 0x18c   :  { %926 = vmatpush.msra.mxu3 %v1978_v14 }
 0x18e   :  { %927 = vmatpush.msra.mxu3 %v1991_v18 }
 0x1f5   :  { %v599_v40 = vpop.f32.mrf.mxu0 }
 0x1f6   :  { %v600_v45 = vadd.f32 %v2089_v49, %v599_v40  ;;  %v1656_v40 = vld [vmem:[%s2415_s0 + $0x20] sm:$0xff] }
 0x1f7   :  { %1657 = vmatmul.msk.f32.vlgmr.msra.gmra.mxu1 %vm109_vm0, %v1656_v40 }
 0x1f8   :  { %1039 = vmatpush.msra.mxu1 %v1965_v9 }
 0x1fa   :  { %v559_v54 = vpop.f32.mrf.mxu3  ;;  %v579_v56 = vpop.f32.mrf.mxu2 }
 0x1fb   :  { %v560_v58 = vadd.f32 %v2058_v31, %v559_v54  ;;  %v580_v59 = vadd.f32 %v2046_v26, %v579_v56 }
 0x1fd   :  { %v602_v60 = vadd.f32 %v560_v58, %v497_v57  ;;  %v622_v61 = vadd.f32 %v580_v59, %v517_v53 }
 0x1ff   :  { %v1645_v62 = vmul.f32 -1.442695, %v602_v60  ;;  %v1646_v63 = vmul.f32 -1.442695, %v622_v61 }
 0x201   :  { %1728 = vpow2.f32 %v1645_v62 }
 0x202   :  { %1730 = vpow2.f32 %v1646_v63 }
 0x207   :  { %v1729_v23 = vpop.eup %1728 }
 0x208   :  { %v1731_v25 = vpop.eup %1730  ;;  %v606_v27 = vadd.f32 1.0, %v1729_v23 }
 0x209   :  { %v626_v29 = vadd.f32 1.0, %v1731_v25 }
 0x20a   :  { %1732 = vrcp.f32 %v606_v27  ;;  %v618_v37 = vand.u32 2147483648, %v606_v27  ;;  %v616_v39 = vand.u32 2147483647, %v606_v27  ;;  %vm612_vm5 = vweird.f32 %v606_v27 }
 0x20b   :  { %1734 = vrcp.f32 %v626_v29  ;;  %v638_v52 = vand.u32 2147483648, %v626_v29  ;;  %vm632_vm9 = vweird.f32 %v626_v29  ;;  %v636_v54 = vand.u32 2147483647, %v626_v29 }
 0x20c   :  { %v619_v44 = vor.u32 1.1754944e-38, %v618_v37  ;;  %vm617_vm7 = vcmp.eq.f32.partialorder %v616_v39, 8.507059e+37 }
 0x20d   :  { %v639_v58 = vor.u32 1.1754944e-38, %v638_v52  ;;  %vm637_vm11 = vcmp.eq.f32.partialorder %v636_v54, 8.507059e+37 }
 0x210   :  { %v1733_v30 = vpop.eup %1732 }
 0x211   :  { %v1735_v32 = vpop.eup %1734  ;;  %v608_v33 = vmul.f32 %v1733_v30, %v606_v27  ;;  %vm613_vm4 = vweird.f32 %v1733_v30 }
 0x212   :  { %v628_v34 = vmul.f32 %v1735_v32, %v626_v29  ;;  %vm614_vm6 = vmor %vm612_vm5, %vm613_vm4  ;;  %vm633_vm8 = vweird.f32 %v1735_v32  ;;  %v671_v29 = vpop.f32.mrf.mxu1 }
 0x213   :  { %v609_v35 = vsub.f32 1.0, %v608_v33  ;;  %vm634_vm10 = vmor %vm632_vm9, %vm633_vm8  ;;  %v672_v33 = vadd.f32 %v2052_v28, %v671_v29 }
 0x214   :  { %v629_v36 = vsub.f32 1.0, %v628_v34 }
 0x215   :  { %v610_v17 = vmul.f32 %v1733_v30, %v609_v35 }
 0x216   :  { %v630_v41 = vmul.f32 %v1735_v32, %v629_v36 }
 0x217   :  { %v611_v43 = vadd.f32 %v1733_v30, %v610_v17 }
 0x218   :  { %v631_v51 = vadd.f32 %v1735_v32, %v630_v41 }
 0x219   :  { %v615_v47 = vsel %vm614_vm6, %v1733_v30, %v611_v43 }
 0x21a   :  { %v620_v48 = vsel %vm617_vm7, %v619_v44, %v615_v47  ;;  %v635_v57 = vsel %vm634_vm10, %v1735_v32, %v631_v51 }
 0x21b   :  { %v642_v53 = vmul.f32 %v620_v48, %v600_v45  ;;  %v640_v59 = vsel %vm637_vm11, %v639_v58, %v635_v57  ;;  %v711_v57 = vpop.f32.mrf.mxu1 }
 0x21c   :  { %v645_v60 = vsub.f32 1.0, %v640_v59  ;;  %v647_v63 = vmul.f32 %v640_v59, %v2141_v50  ;;  %v691_v50 = vpop.f32.mrf.mxu3 }
 0x21d   :  { %v643_v56 = vadd.f32 %v642_v53, %v537_v46  ;;  %v692_v23 = vadd.f32 %v2041_v24, %v691_v50 }
 0x21f   :  { %1736 = vtanh.f32 %v643_v56 }
 0x225   :  { %v1737_v61 = vpop.eup %1736 }
 0x226   :  { %v646_v62 = vmul.f32 %v1737_v61, %v645_v60 }
 0x228   :  { %v2183_v6 = vadd.f32 %v647_v63, %v646_v62  ;;  %v712_v62 = vadd.f32 %v2094_v55, %v711_v57 }
 0x22a   :  { %1651 = vmatmul.msk.f32.vlgmr.msrb.gmra.mxu2 %vm182_vm1, %v2183_v6  ;;  %1652 = vmatmul.msk.f32.vlgmr.msrb.gmra.mxu0 %vm182_vm1, %v2183_v6 }
 0x22b   :  { %1653 = vmatmul.msk.f32.vlgmr.msrb.gmra.mxu3 %vm182_vm1, %v2183_v6  ;;  %942 = vmatpush.msrb.mxu2 %v1973_v12 }
 0x22c   :  { %1019 = vmatpush.msrb.mxu0 %v1942_v1  ;;  %1059 = vmatpush.msrb.mxu3 %v1983_v16 }
 0x22d   :  { %943 = vmatpush.msrb.mxu2 %v1981_v15 }
 0x22f   :  { %944 = vmatpush.msrb.mxu2 %v1995_v19 }
 0x231   :  { %945 = vmatpush.msrb.mxu2 %v2001_v20 }
 0x232   :  { %1658 = vmatmul.msk.f32.vlgmr.msra.gmra.mxu2 %vm109_vm0, %v1656_v40  ;;  %1659 = vmatmul.msk.f32.vlgmr.msra.gmra.mxu0 %vm109_vm0, %v1656_v40 }
 0x233   :  { %946 = vmatpush.msrb.mxu2 %v2009_v21  ;;  %1077 = vmatpush.msra.mxu0 %v1940_v0 }
 0x235   :  { %947 = vmatpush.msrb.mxu2 %v2014_v22  ;;  %1078 = vmatpush.msra.mxu0 %v1944_v2 }
 0x237   :  { %1097 = vmatpush.msra.mxu2 %v1948_v3  ;;  %1079 = vmatpush.msra.mxu0 %v1953_v5 }
 0x239   :  { %1098 = vmatpush.msra.mxu2 %v1950_v4  ;;  %1080 = vmatpush.msra.mxu0 %v1963_v8 }
 0x23b   :  { %1099 = vmatpush.msra.mxu2 %v1960_v7  ;;  %1081 = vmatpush.msra.mxu0 %v1968_v10 }
 0x23d   :  { %1100 = vmatpush.msra.mxu2 %v1970_v11  ;;  %1082 = vmatpush.msra.mxu0 %v1976_v13 }
 0x23f   :  { %1101 = vmatpush.msra.mxu2 %v1978_v14 }
 0x241   :  { %1102 = vmatpush.msra.mxu2 %v1991_v18 }
 0x2a7   :  { %v754_v25 = vpop.f32.mrf.mxu0 }
 0x2a8   :  { %v755_v27 = vadd.f32 %v2046_v26, %v754_v25 }
 0x2aa   :  { %v797_v30 = vadd.f32 %v755_v27, %v692_v23 }
 0x2ac   :  { %v1655_v32 = vmul.f32 -1.442695, %v797_v30 }
 0x2ad   :  { %v734_v34 = vpop.f32.mrf.mxu2 }
 0x2ae   :  { %1738 = vpow2.f32 %v1655_v32  ;;  %v735_v35 = vadd.f32 %v2058_v31, %v734_v34  ;;  %v774_v56 = vpop.f32.mrf.mxu3 }
 0x2af   :  { %v775_v60 = vadd.f32 %v2089_v49, %v774_v56 }
 0x2b0   :  { %v777_v36 = vadd.f32 %v735_v35, %v672_v33 }
 0x2b2   :  { %v1654_v37 = vmul.f32 -1.442695, %v777_v36 }
 0x2b4   :  { %v1739_v17 = vpop.eup %1738  ;;  %1740 = vpow2.f32 %v1654_v37 }
 0x2b5   :  { %v801_v39 = vadd.f32 1.0, %v1739_v17 }
 0x2b7   :  { %1742 = vrcp.f32 %v801_v39  ;;  %v813_v23 = vand.u32 2147483648, %v801_v39  ;;  %vm807_vm3 = vweird.f32 %v801_v39  ;;  %v811_v27 = vand.u32 2147483647, %v801_v39 }
 0x2b9   :  { %v814_v32 = vor.u32 1.1754944e-38, %v813_v23  ;;  %vm812_vm5 = vcmp.eq.f32.partialorder %v811_v27, 8.507059e+37 }
 0x2ba   :  { %v1741_v41 = vpop.eup %1740 }
 0x2bb   :  { %v781_v42 = vadd.f32 1.0, %v1741_v41 }
 0x2bd   :  { %1744 = vrcp.f32 %v781_v42  ;;  %v1743_v43 = vpop.eup %1742  ;;  %v793_v51 = vand.u32 2147483648, %v781_v42  ;;  %v791_v53 = vand.u32 2147483647, %v781_v42  ;;  %vm787_vm13 = vweird.f32 %v781_v42 }
 0x2be   :  { %v803_v44 = vmul.f32 %v1743_v43, %v801_v39  ;;  %vm808_vm2 = vweird.f32 %v1743_v43 }
 0x2bf   :  { %v794_v59 = vor.u32 1.1754944e-38, %v793_v51  ;;  %vm792_vm15 = vcmp.eq.f32.partialorder %v791_v53, 8.507059e+37  ;;  %vm809_vm4 = vmor %vm807_vm3, %vm808_vm2 }
 0x2c0   :  { %v804_v47 = vsub.f32 1.0, %v803_v44 }
 0x2c2   :  { %v805_v54 = vmul.f32 %v1743_v43, %v804_v47  ;;  %v1665_v47 = vld [vmem:[%s2415_s0 + $0x28] sm:$0xff] }
 0x2c3   :  { %v1745_v45 = vpop.eup %1744  ;;  %1666 = vmatmul.msk.f32.vlgmr.msrb.gmra.mxu0 %vm109_vm0, %v1665_v47 }
 0x2c4   :  { %v783_v46 = vmul.f32 %v1745_v45, %v781_v42  ;;  %vm788_vm12 = vweird.f32 %v1745_v45  ;;  %v806_v50 = vadd.f32 %v1743_v43, %v805_v54  ;;  %1214 = vmatpush.msrb.mxu0 %v1965_v9  ;;  %v886_v54 = vpop.f32.mrf.mxu0 }
 0x2c5   :  { %vm789_vm14 = vmor %vm787_vm13, %vm788_vm12 }
 0x2c6   :  { %v784_v48 = vsub.f32 1.0, %v783_v46  ;;  %v810_v30 = vsel %vm809_vm4, %v1743_v43, %v806_v50 }
 0x2c7   :  { %v815_v33 = vsel %vm812_vm5, %v814_v32, %v810_v30 }
 0x2c8   :  { %v785_v52 = vmul.f32 %v1745_v45, %v784_v48  ;;  %v820_v34 = vsub.f32 1.0, %v815_v33  ;;  %v822_v37 = vmul.f32 %v815_v33, %v2183_v6  ;;  %v846_v6 = vpop.f32.mrf.mxu1 }
 0x2c9   :  { %v847_v40 = vadd.f32 %v2052_v28, %v846_v6 }
 0x2ca   :  { %v786_v58 = vadd.f32 %v1745_v45, %v785_v52 }
 0x2cc   :  { %v790_v61 = vsel %vm789_vm14, %v1745_v45, %v786_v58 }
 0x2cd   :  { %v795_v63 = vsel %vm792_vm15, %v794_v59, %v790_v61 }
 0x2ce   :  { %v817_v25 = vmul.f32 %v795_v63, %v775_v60 }
 0x2d0   :  { %v818_v29 = vadd.f32 %v817_v25, %v712_v62 }
 0x2d2   :  { %1746 = vtanh.f32 %v818_v29 }
 0x2d8   :  { %v1747_v35 = vpop.eup %1746 }
 0x2d9   :  { %v821_v36 = vmul.f32 %v1747_v35, %v820_v34 }
 0x2db   :  { %v2225_v17 = vadd.f32 %v822_v37, %v821_v36  ;;  %v1792_v37 = vld [vmem:[#allocation2] sm:$0xff] }
 0x2dd   :  { %1660 = vmatmul.msk.f32.vlgmr.msrb.gmra.mxu1 %vm182_vm1, %v2225_v17  ;;  %1661 = vmatmul.msk.f32.vlgmr.msra.gmra.mxu3 %vm182_vm1, %v2225_v17 }
 0x2de   :  { %1662 = vmatmul.msk.f32.vlgmr.msrb.gmra.mxu2 %vm182_vm1, %v2225_v17  ;;  %1117 = vmatpush.msrb.mxu1 %v1973_v12 }
 0x2df   :  { %1194 = vmatpush.msra.mxu3 %v1942_v1  ;;  %1234 = vmatpush.msrb.mxu2 %v1983_v16  ;;  %v866_v1 = vpop.f32.mrf.mxu2 }
 0x2e0   :  { %1118 = vmatpush.msrb.mxu1 %v1981_v15  ;;  %v867_v43 = vadd.f32 %v2041_v24, %v866_v1 }
 0x2e2   :  { %1119 = vmatpush.msrb.mxu1 %v1995_v19 }
 0x2e4   :  { %1120 = vmatpush.msrb.mxu1 %v2001_v20 }
 0x2e5   :  { %1667 = vmatmul.msk.f32.vlgmr.msra.gmra.mxu1 %vm109_vm0, %v1665_v47  ;;  %1668 = vmatmul.msk.f32.vlgmr.msrb.gmra.mxu3 %vm109_vm0, %v1665_v47  ;;  %v1800_v47 = vld [vmem:[#allocation4 + $0x10] sm:$0xff] }
 0x2e6   :  { %1121 = vmatpush.msrb.mxu1 %v2009_v21  ;;  %1252 = vmatpush.msrb.mxu3 %v1940_v0 }
 0x2e8   :  { %1122 = vmatpush.msrb.mxu1 %v2014_v22  ;;  %1253 = vmatpush.msrb.mxu3 %v1944_v2 }
 0x2ea   :  { %1272 = vmatpush.msra.mxu1 %v1948_v3  ;;  %1254 = vmatpush.msrb.mxu3 %v1953_v5 }
 0x2ec   :  { %1273 = vmatpush.msra.mxu1 %v1950_v4  ;;  %1255 = vmatpush.msrb.mxu3 %v1963_v8 }
 0x2ee   :  { %1274 = vmatpush.msra.mxu1 %v1960_v7  ;;  %1256 = vmatpush.msrb.mxu3 %v1968_v10 }
 0x2f0   :  { %1275 = vmatpush.msra.mxu1 %v1970_v11  ;;  %1257 = vmatpush.msrb.mxu3 %v1976_v13  ;;  %v887_v13 = vadd.f32 %v2094_v55, %v886_v54 }
 0x2f2   :  { %1276 = vmatpush.msra.mxu1 %v1978_v14 }
 0x2f4   :  { %1277 = vmatpush.msra.mxu1 %v1991_v18 }
 0x35a   :  { %v909_v39 = vpop.f32.mrf.mxu1 }
 0x35b   :  { %v910_v41 = vadd.f32 %v2058_v31, %v909_v39 }
 0x35d   :  { %v952_v42 = vadd.f32 %v910_v41, %v847_v40 }
 0x35f   :  { %v1663_v44 = vmul.f32 -1.442695, %v952_v42 }
 0x360   :  { %v929_v45 = vpop.f32.mrf.mxu3 }
 0x361   :  { %1748 = vpow2.f32 %v1663_v44  ;;  %v930_v46 = vadd.f32 %v2046_v26, %v929_v45  ;;  %v949_v56 = vpop.f32.mrf.mxu2  ;;  %v1798_v45 = vld [vmem:[#allocation4 + $0x18] sm:$0xff] }
 0x362   :  { %v950_v18 = vadd.f32 %v2089_v49, %v949_v56 }
 0x363   :  { %v972_v48 = vadd.f32 %v930_v46, %v867_v43  ;;  %v1797_v43 = vld [vmem:[#allocation4 + $0x50] sm:$0xff]  ;;  %v1799_v46 = vld [vmem:[#allocation4 + $0x48] sm:$0xff] }
 0x365   :  { %v1664_v51 = vmul.f32 -1.442695, %v972_v48  ;;  %v1801_v48 = vld [vmem:[#allocation4 + $0x40] sm:$0xff] }
 0x367   :  { %v1749_v52 = vpop.eup %1748  ;;  %1750 = vpow2.f32 %v1664_v51 }
 0x368   :  { %v956_v53 = vadd.f32 1.0, %v1749_v52  ;;  %v2295_v52 = vld [vmem:[%s2415_s0 + $0x38] sm:$0xff] }
 0x36a   :  { %1752 = vrcp.f32 %v956_v53  ;;  %v968_v5 = vand.u32 2147483648, %v956_v53  ;;  %v966_v8 = vand.u32 2147483647, %v956_v53  ;;  %vm962_vm7 = vweird.f32 %v956_v53 }
 0x36c   :  { %v969_v14 = vor.u32 1.1754944e-38, %v968_v5  ;;  %vm967_vm9 = vcmp.eq.f32.partialorder %v966_v8, 8.507059e+37 }
 0x36d   :  { %v1751_v9 = vpop.eup %1750 }
 0x36e   :  { %v976_v0 = vadd.f32 1.0, %v1751_v9  ;;  %v1803_v9 = vld [vmem:[#allocation4 + $0x38] sm:$0xff] }
 0x370   :  { %v1753_v2 = vpop.eup %1752  ;;  %1754 = vrcp.f32 %v976_v0  ;;  %v988_v62 = vand.u32 2147483648, %v976_v0  ;;  %v986_v50 = vand.u32 2147483647, %v976_v0  ;;  %vm982_vm11 = vweird.f32 %v976_v0 }
 0x371   :  { %v958_v3 = vmul.f32 %v1753_v2, %v956_v53  ;;  %vm963_vm6 = vweird.f32 %v1753_v2  ;;  %v1802_v53 = vld [vmem:[#allocation4 + $0x8] sm:$0xff] }
 0x372   :  { %vm964_vm8 = vmor %vm962_vm7, %vm963_vm6  ;;  %v989_v29 = vor.u32 1.1754944e-38, %v988_v62  ;;  %vm987_vm13 = vcmp.eq.f32.partialorder %v986_v50, 8.507059e+37 }
 0x373   :  { %v959_v4 = vsub.f32 1.0, %v958_v3  ;;  %v1805_v3 = vld [vmem:[#allocation4 + $0x30] sm:$0xff] }
 0x375   :  { %v960_v7 = vmul.f32 %v1753_v2, %v959_v4 }
 0x376   :  { %v1755_v11 = vpop.eup %1754 }
 0x377   :  { %v978_v57 = vmul.f32 %v1755_v11, %v976_v0  ;;  %v961_v10 = vadd.f32 %v1753_v2, %v960_v7  ;;  %vm983_vm10 = vweird.f32 %v1755_v11 }
 0x378   :  { %vm984_vm12 = vmor %vm982_vm11, %vm983_vm10 }
 0x379   :  { %v979_v58 = vsub.f32 1.0, %v978_v57  ;;  %v965_v59 = vsel %vm964_vm8, %v1753_v2, %v961_v10  ;;  %v1804_v2 = vld [vmem:[#allocation4] sm:$0xff]  ;;  %v1061_v10 = vpop.f32.mrf.mxu3 }
 0x37a   :  { %v970_v60 = vsel %vm967_vm9, %v969_v14, %v965_v59 }
 0x37b   :  { %v980_v61 = vmul.f32 %v1755_v11, %v979_v58  ;;  %v992_v63 = vmul.f32 %v970_v60, %v950_v18 }
 0x37d   :  { %v981_v23 = vadd.f32 %v1755_v11, %v980_v61  ;;  %v993_v25 = vadd.f32 %v992_v63, %v887_v13  ;;  %v1062_v61 = vadd.f32 %v2094_v55, %v1061_v10 }
 0x37f   :  { %v985_v27 = vsel %vm984_vm12, %v1755_v11, %v981_v23  ;;  %1756 = vtanh.f32 %v993_v25 }
 0x380   :  { %v990_v30 = vsel %vm987_vm13, %v989_v29, %v985_v27 }
 0x381   :  { %v995_v32 = vsub.f32 1.0, %v990_v30  ;;  %v997_v35 = vmul.f32 %v990_v30, %v2225_v17  ;;  %v1021_v17 = vpop.f32.mrf.mxu0 }
 0x382   :  { %v1022_v39 = vadd.f32 %v2052_v28, %v1021_v17  ;;  %v1529_v17 = vld [vmem:[%s2421_s6 + $0x28] sm:$0xff] }
 0x385   :  { %v1757_v33 = vpop.eup %1756 }
 0x386   :  { %v996_v34 = vmul.f32 %v1757_v33, %v995_v32 }
 0x388   :  { %v2267_v36 = vadd.f32 %v997_v35, %v996_v34 }
 0x38a   :  { %1669 = vmatmul.msk.f32.vlgmr.msra.gmra.mxu0 %vm182_vm1, %v2267_v36  ;;  %1670 = vmatmul.msk.f32.vlgmr.msra.gmra.mxu2 %vm182_vm1, %v2267_v36 }
 0x38b   :  { %1671 = vmatmul.msk.f32.vlgmr.msrb.gmra.mxu1 %vm182_vm1, %v2267_v36  ;;  %1292 = vmatpush.msra.mxu0 %v1973_v12 }
 0x38c   :  { %1409 = vmatpush.msrb.mxu1 %v1983_v16  ;;  %1369 = vmatpush.msra.mxu2 %v1792_v37  ;;  %v1041_v16 = vpop.f32.mrf.mxu1 }
 0x38d   :  { %1293 = vmatpush.msra.mxu0 %v1981_v15  ;;  %v1042_v41 = vadd.f32 %v2041_v24, %v1041_v16  ;;  %v1794_v24 = vld [vmem:[#allocation4 + $0x28] sm:$0xff]  ;;  %v1525_v16 = vld [vmem:[%s2421_s6 + $0x8] sm:$0xff] }
 0x38f   :  { %1294 = vmatpush.msra.mxu0 %v1995_v19 }
 0x391   :  { %1295 = vmatpush.msra.mxu0 %v2001_v20  ;;  %v1674_v20 = vld [vmem:[%s2415_s0 + $0x30] sm:$0xff] }
 0x392   :  { %1675 = vmatmul.msk.f32.vlgmr.msra.gmra.mxu3 %vm109_vm0, %v1674_v20  ;;  %1676 = vmatmul.msk.f32.vlgmr.msrb.gmra.mxu0 %vm109_vm0, %v1674_v20 }
 0x393   :  { %1296 = vmatpush.msra.mxu0 %v2009_v21  ;;  %1677 = vmatmul.msk.f32.vlgmr.msrb.gmra.mxu2 %vm109_vm0, %v1674_v20  ;;  %v1811_v20 = vld [vmem:[#allocation4 + $0x60] sm:$0xff] }
 0x394   :  { %1427 = vmatpush.msrb.mxu2 %v1794_v24 }
 0x395   :  { %1297 = vmatpush.msra.mxu0 %v2014_v22  ;;  %v1793_v22 = vld [vmem:[#allocation2 + $0x8] sm:$0xff] }
 0x396   :  { %1389 = vmatpush.msra.mxu3 %v1793_v22 }
 0x39b   :  { %1684 = vmatmul.msk.f32.vlgmr.msra.gmra.mxu2 %vm109_vm0, %v2295_v52 }
 0x407   :  { %v1084_v6 = vpop.f32.mrf.mxu0 }
 0x408   :  { %v1085_v12 = vadd.f32 %v2058_v31, %v1084_v6  ;;  %v1795_v31 = vld [vmem:[#allocation4 + $0x58] sm:$0xff]  ;;  %v1124_v54 = vpop.f32.mrf.mxu1  ;;  %v1528_v6 = vld [vmem:[%s2421_s6 + $0x20] sm:$0xff] }
 0x409   :  { %1447 = vmatpush.msrb.mxu0 %v1795_v31  ;;  %v1125_v58 = vadd.f32 %v2089_v49, %v1124_v54 }
 0x40a   :  { %v1127_v40 = vadd.f32 %v1085_v12, %v1022_v39  ;;  %v1806_v39 = vld [vmem:[#allocation4 + $0x88] sm:$0xff]  ;;  %v1526_v12 = vld [vmem:[%s2421_s6 + $0x10] sm:$0xff] }
 0x40b   :  { %1448 = vmatpush.msrb.mxu0 %v1797_v43 }
 0x40c   :  { %v1672_v42 = vmul.f32 -1.442695, %v1127_v40  ;;  %v1807_v40 = vld [vmem:[#allocation4 + $0x80] sm:$0xff] }
 0x40d   :  { %v1104_v15 = vpop.f32.mrf.mxu2  ;;  %1449 = vmatpush.msrb.mxu0 %v1799_v46 }
 0x40e   :  { %1758 = vpow2.f32 %v1672_v42  ;;  %v1105_v19 = vadd.f32 %v2046_v26, %v1104_v15  ;;  %v1796_v26 = vld [vmem:[#allocation4 + $0x20] sm:$0xff]  ;;  %v1524_v42 = vld [vmem:[%s2421_s6] sm:$0xff]  ;;  %v1809_v15 = vld [vmem:[#allocation4 + $0x70] sm:$0xff] }
 0x40f   :  { %1428 = vmatpush.msrb.mxu2 %v1796_v26  ;;  %1450 = vmatpush.msrb.mxu0 %v1801_v48  ;;  %v1216_v22 = vpop.f32.mrf.mxu0 }
 0x410   :  { %v1147_v21 = vadd.f32 %v1105_v19, %v1042_v41  ;;  %v1808_v41 = vld [vmem:[#allocation4 + $0x78] sm:$0xff]  ;;  %v1810_v19 = vld [vmem:[#allocation4 + $0x68] sm:$0xff] }
 0x411   :  { %1429 = vmatpush.msrb.mxu2 %v1798_v45  ;;  %1451 = vmatpush.msrb.mxu0 %v1803_v9  ;;  %v2349_v45 = vld [vmem:[%s2419_s4] ss:$0 sm:$0xff] }
 0x412   :  { %v1673_v28 = vmul.f32 -1.442695, %v1147_v21 }
 0x413   :  { %1430 = vmatpush.msrb.mxu2 %v1800_v47  ;;  %1452 = vmatpush.msrb.mxu0 %v1805_v3  ;;  %v2355_v47 = vld [vmem:[%s2420_s5] ss:$0 sm:$0xff] }
 0x414   :  { %v1759_v1 = vpop.eup %1758  ;;  %1760 = vpow2.f32 %v1673_v28  ;;  %v2337_v28 = vld [vmem:[%s2419_s4 + $0x1] ss:$0 sm:$0xff] }
 0x415   :  { %v1131_v44 = vadd.f32 1.0, %v1759_v1  ;;  %1431 = vmatpush.msrb.mxu2 %v1802_v53  ;;  %v1196_v21 = vpop.f32.mrf.mxu3  ;;  %v1217_v24 = vadd.f32 %v2337_v28, %v1216_v22  ;;  %v2343_v1 = vld [vmem:[%s2420_s5 + $0x1] ss:$0 sm:$0xff] }
 0x416   :  { %v1197_v46 = vadd.f32 %v2349_v45, %v1196_v21 }
 0x417   :  { %1762 = vrcp.f32 %v1131_v44  ;;  %1432 = vmatpush.msrb.mxu2 %v1804_v2  ;;  %v1143_v8 = vand.u32 2147483648, %v1131_v44  ;;  %v1141_v56 = vand.u32 2147483647, %v1131_v44  ;;  %vm1137_vm15 = vweird.f32 %v1131_v44 }
 0x419   :  { %v1144_v18 = vor.u32 1.1754944e-38, %v1143_v8  ;;  %vm1142_vm3 = vcmp.eq.f32.partialorder %v1141_v56, 8.507059e+37 }
 0x41a   :  { %v1761_v51 = vpop.eup %1760 }
 0x41b   :  { %v1151_v0 = vadd.f32 1.0, %v1761_v51 }
 0x41d   :  { %v1763_v4 = vpop.eup %1762  ;;  %1764 = vrcp.f32 %v1151_v0  ;;  %v1163_v23 = vand.u32 2147483648, %v1151_v0  ;;  %v1161_v25 = vand.u32 2147483647, %v1151_v0  ;;  %vm1157_vm5 = vweird.f32 %v1151_v0 }
 0x41e   :  { %v1133_v5 = vmul.f32 %v1763_v4, %v1131_v44  ;;  %vm1138_vm14 = vweird.f32 %v1763_v4 }
 0x41f   :  { %vm1139_vm2 = vmor %vm1137_vm15, %vm1138_vm14  ;;  %v1164_v32 = vor.u32 1.1754944e-38, %v1163_v23  ;;  %vm1162_vm7 = vcmp.eq.f32.partialorder %v1161_v25, 8.507059e+37 }
 0x420   :  { %v1134_v7 = vsub.f32 1.0, %v1133_v5  ;;  %v1557_v5 = vld [vmem:[%s2423_s8] sm:$0xff] }
 0x422   :  { %v1135_v11 = vmul.f32 %v1763_v4, %v1134_v7 }
 0x423   :  { %v1765_v57 = vpop.eup %1764 }
 0x424   :  { %v1136_v14 = vadd.f32 %v1763_v4, %v1135_v11  ;;  %v1153_v13 = vmul.f32 %v1765_v57, %v1151_v0  ;;  %vm1158_vm4 = vweird.f32 %v1765_v57 }
 0x425   :  { %vm1159_vm6 = vmor %vm1157_vm5, %vm1158_vm4  ;;  %vm1591_vm4 = vcmask 31744  }
 0x426   :  { %v1140_v59 = vsel %vm1139_vm2, %v1763_v4, %v1136_v14  ;;  %v1154_v60 = vsub.f32 1.0, %v1153_v13  ;;  %v1558_v4 = vld [vmem:[%s2423_s8 + $0x8] sm:$0xf] }
 0x427   :  { %v1145_v62 = vsel %vm1142_vm3, %v1144_v18, %v1140_v59  ;;  %v1236_v18 = vpop.f32.mrf.mxu2  ;;  %vm1563_vm3 = vcmask 97280  }
 0x428   :  { %v1167_v63 = vmul.f32 %v1145_v62, %v1125_v58  ;;  %v1155_v50 = vmul.f32 %v1765_v57, %v1154_v60 }
 0x42a   :  { %v1156_v27 = vadd.f32 %v1765_v57, %v1155_v50  ;;  %v1168_v29 = vadd.f32 %v1167_v63, %v1062_v61  ;;  %v2367_v61 = vld [vmem:[%s2420_s5 + $0x2] ss:$0 sm:$0xff] }
 0x42b   :  { %v2373_v63 = vld [vmem:[%s2419_s4 + $0x2] ss:$0 sm:$0xff] }
 0x42c   :  { %v1160_v30 = vsel %vm1159_vm6, %v1765_v57, %v1156_v27  ;;  %1766 = vtanh.f32 %v1168_v29  ;;  %v1237_v50 = vadd.f32 %v2373_v63, %v1236_v18 }
 0x42d   :  { %v1165_v49 = vsel %vm1162_vm7, %v1164_v32, %v1160_v30 }
 0x42e   :  { %v1170_v33 = vsub.f32 1.0, %v1165_v49  ;;  %v1172_v55 = vmul.f32 %v1165_v49, %v2267_v36  ;;  %v1527_v36 = vld [vmem:[%s2421_s6 + $0x18] sm:$0xff] }
 0x432   :  { %v1767_v34 = vpop.eup %1766 }
 0x433   :  { %v1171_v35 = vmul.f32 %v1767_v34, %v1170_v33 }
 0x435   :  { %v2302_v37 = vadd.f32 %v1172_v55, %v1171_v35 }
 0x437   :  { %1678 = vmatmul.msk.f32.vlgmr.msrb.gmra.mxu3 %vm182_vm1, %v2302_v37  ;;  %1679 = vmatmul.msk.f32.vlgmr.msra.gmra.mxu1 %vm182_vm1, %v2302_v37 }
 0x438   :  { %1680 = vmatmul.msk.f32.vlgmr.msra.gmra.mxu0 %vm182_vm1, %v2302_v37  ;;  %1544 = vmatpush.msra.mxu1 %v1529_v17 }
 0x439   :  { %1467 = vmatpush.msrb.mxu3 %v1806_v39 }
 0x43a   :  { %1545 = vmatpush.msra.mxu1 %v1528_v6 }
 0x43b   :  { %1468 = vmatpush.msrb.mxu3 %v1807_v40 }
 0x43c   :  { %1546 = vmatpush.msra.mxu1 %v1527_v36  ;;  %v1706_v36 = vld [vmem:[%s2422_s7] ss:$0 sm:$0xff] }
 0x43d   :  { %1469 = vmatpush.msrb.mxu3 %v1808_v41 }
 0x43e   :  { %1547 = vmatpush.msra.mxu1 %v1526_v12 }
 0x43f   :  { %1686 = vmatmul.msk.f32.vlgmr.msrb.gmra.mxu1 %vm109_vm0, %v2295_v52  ;;  %1685 = vmatmul.msk.f32.vlgmr.msra.gmra.mxu3 %vm109_vm0, %v2295_v52  ;;  %vm1567_vm0 = vcmask 1043456  }
 0x440   :  { %1548 = vmatpush.msra.mxu1 %v1525_v16  ;;  %1470 = vmatpush.msrb.mxu3 %v1809_v15 }
 0x441   :  { %1693 = vmatpush.msk.msra.mxu2 %vm1567_vm0, %v1558_v4 }
 0x442   :  { %1549 = vmatpush.msra.mxu1 %v1524_v42  ;;  %1471 = vmatpush.msrb.mxu3 %v1810_v19  ;;  %v1371_v19 = vpop.f32.mrf.mxu2 }
 0x443   :  { %1586 = vmatpush.msra.mxu2 %v1557_v5 }
 0x444   :  { %1472 = vmatpush.msrb.mxu3 %v1811_v20 }
 0x447   :  { %1692 = vmatmul.msk.f32.vlgmr.msra.gmra.mxu1 %vm182_vm1, %v2099_v38 }
 0x4b4   :  { %v1279_v31 = vpop.f32.mrf.mxu1 }
 0x4b5   :  { %v1280_v26 = vadd.f32 %v2343_v1, %v1279_v31  ;;  %v1299_v58 = vpop.f32.mrf.mxu0 }
 0x4b6   :  { %v1300_v62 = vadd.f32 %v2367_v61, %v1299_v58 }
 0x4b7   :  { %v1322_v43 = vadd.f32 %v1280_v26, %v1217_v24 }
 0x4b9   :  { %v1682_v44 = vmul.f32 -1.442695, %v1322_v43  ;;  %v1372_v43 = vadd.f32 %v2349_v45, %v1371_v19 }
 0x4ba   :  { %v1259_v38 = vpop.f32.mrf.mxu3 }
 0x4bb   :  { %1768 = vpow2.f32 %v1682_v44  ;;  %v1260_v48 = vadd.f32 %v2355_v47, %v1259_v38 }
 0x4bc   :  { %v2376_v32 = vpop.f32.mrf.mxu1 }
 0x4bd   :  { %v1302_v51 = vadd.f32 %v1260_v48, %v1197_v46  ;;  %v1707_v48 = vld [vmem:[%s2424_s9] ss:$0 sm:$0xff] }
 0x4bf   :  { %v1681_v52 = vmul.f32 -1.442695, %v1302_v51 }
 0x4c1   :  { %v1769_v53 = vpop.eup %1768  ;;  %1770 = vpow2.f32 %v1681_v52 }
 0x4c2   :  { %v1326_v9 = vadd.f32 1.0, %v1769_v53  ;;  %v1391_v20 = vpop.f32.mrf.mxu3 }
 0x4c4   :  { %1772 = vrcp.f32 %v1326_v9  ;;  %v1338_v29 = vand.u32 2147483648, %v1326_v9  ;;  %vm1332_vm13 = vweird.f32 %v1326_v9  ;;  %v1336_v49 = vand.u32 2147483647, %v1326_v9  ;;  %v1551_v39 = vpop.f32.mrf.mxu1 }
 0x4c5   :  { %v1552_v41 = vadd.f32 %v1706_v36, %v1551_v39 }
 0x4c6   :  { %v1339_v35 = vor.u32 1.1754944e-38, %v1338_v29  ;;  %vm1337_vm15 = vcmp.eq.f32.partialorder %v1336_v49, 8.507059e+37 }
 0x4c7   :  { %v1771_v0 = vpop.eup %1770  ;;  %v1555_v42 = vmul.f32 0.01, %v1552_v41  ;;  %vm1554_vm2 = vcmp.ge.f32.partialorder %v1552_v41, 0.0 }
 0x4c8   :  { %v1306_v2 = vadd.f32 1.0, %v1771_v0 }
 0x4c9   :  { %v1556_v15 = vsel %vm1554_vm2, %v1552_v41, %v1555_v42 }
 0x4ca   :  { %1774 = vrcp.f32 %v1306_v2  ;;  %v1773_v3 = vpop.eup %1772  ;;  %v1318_v57 = vand.u32 2147483648, %v1306_v2  ;;  %v1316_v14 = vand.u32 2147483647, %v1306_v2  ;;  %vm1312_vm9 = vweird.f32 %v1306_v2 }
 0x4cb   :  { %v1328_v7 = vmul.f32 %v1773_v3, %v1326_v9  ;;  %vm1333_vm12 = vweird.f32 %v1773_v3 }
 0x4cc   :  { %v1319_v60 = vor.u32 1.1754944e-38, %v1318_v57  ;;  %vm1317_vm11 = vcmp.eq.f32.partialorder %v1316_v14, 8.507059e+37  ;;  %vm1334_vm14 = vmor %vm1332_vm13, %vm1333_vm12 }
 0x4cd   :  { %v1329_v11 = vsub.f32 1.0, %v1328_v7 }
 0x4cf   :  { %v1330_v13 = vmul.f32 %v1773_v3, %v1329_v11 }
 0x4d0   :  { %v1775_v8 = vpop.eup %1774 }
 0x4d1   :  { %v1308_v54 = vmul.f32 %v1775_v8, %v1306_v2  ;;  %vm1313_vm8 = vweird.f32 %v1775_v8  ;;  %v1331_v27 = vadd.f32 %v1773_v3, %v1330_v13 }
 0x4d2   :  { %vm1314_vm10 = vmor %vm1312_vm9, %vm1313_vm8 }
 0x4d3   :  { %v1309_v56 = vsub.f32 1.0, %v1308_v54  ;;  %v1335_v34 = vsel %vm1334_vm14, %v1773_v3, %v1331_v27 }
 0x4d4   :  { %v1340_v55 = vsel %vm1337_vm15, %v1339_v35, %v1335_v34 }
 0x4d5   :  { %v1310_v10 = vmul.f32 %v1775_v8, %v1309_v56  ;;  %v1345_v17 = vsub.f32 1.0, %v1340_v55  ;;  %v1347_v40 = vmul.f32 %v1340_v55, %v2302_v37  ;;  %v1392_v37 = vadd.f32 %v2337_v28, %v1391_v20 }
 0x4d7   :  { %v1311_v59 = vadd.f32 %v1775_v8, %v1310_v10 }
 0x4d9   :  { %v1315_v23 = vsel %vm1314_vm10, %v1775_v8, %v1311_v59  ;;  %v1412_v59 = vadd.f32 %v2373_v63, %v2376_v32 }
 0x4da   :  { %v1320_v25 = vsel %vm1317_vm11, %v1319_v60, %v1315_v23 }
 0x4db   :  { %v1342_v30 = vmul.f32 %v1320_v25, %v1300_v62 }
 0x4dd   :  { %v1343_v33 = vadd.f32 %v1342_v30, %v1237_v50 }
 0x4df   :  { %1776 = vtanh.f32 %v1343_v33 }
 0x4e5   :  { %v1777_v6 = vpop.eup %1776 }
 0x4e6   :  { %v1346_v12 = vmul.f32 %v1777_v6, %v1345_v17 }
 0x4e8   :  { %v2382_v16 = vadd.f32 %v1347_v40, %v1346_v12 }
 0x4ea   :  { %1687 = vmatmul.msk.f32.vlgmr.msrb.gmra.mxu2 %vm182_vm1, %v2382_v16  ;;  %1688 = vmatmul.msk.f32.vlgmr.msrb.gmra.mxu0 %vm182_vm1, %v2382_v16 }
 0x4eb   :  { %1689 = vmatmul.msk.f32.vlgmr.msrb.gmra.mxu3 %vm182_vm1, %v2382_v16 }
 0x4f2   :  { %1694 = vmatmul.msk.f32.vlgmr.msra.gmra.mxu2 %vm1563_vm3, %v1556_v15 }
 0x567   :  { %v1454_v21 = vpop.f32.mrf.mxu0 }
 0x568   :  { %v1455_v22 = vadd.f32 %v2343_v1, %v1454_v21 }
 0x56a   :  { %v1497_v24 = vadd.f32 %v1455_v22, %v1392_v37 }
 0x56c   :  { %v1691_v31 = vmul.f32 -1.442695, %v1497_v24 }
 0x56d   :  { %v1434_v26 = vpop.f32.mrf.mxu2 }
 0x56e   :  { %1778 = vpow2.f32 %v1691_v31  ;;  %v1435_v44 = vadd.f32 %v2355_v47, %v1434_v26  ;;  %v1474_v56 = vpop.f32.mrf.mxu3 }
 0x56f   :  { %v1475_v14 = vadd.f32 %v2367_v61, %v1474_v56 }
 0x570   :  { %v1477_v38 = vadd.f32 %v1435_v44, %v1372_v43 }
 0x572   :  { %v1690_v46 = vmul.f32 -1.442695, %v1477_v38 }
 0x574   :  { %v1779_v51 = vpop.eup %1778  ;;  %1780 = vpow2.f32 %v1690_v46 }
 0x575   :  { %v1501_v28 = vadd.f32 1.0, %v1779_v51  ;;  %v1588_v52 = vpop.f32.mrf.mxu2 }
 0x576   :  { %v1589_v1 = vadd.f32 %v1707_v48, %v1588_v52 }
 0x577   :  { %1782 = vrcp.f32 %v1501_v28  ;;  %v1513_v60 = vand.u32 2147483648, %v1501_v28  ;;  %vm1507_vm9 = vweird.f32 %v1501_v28  ;;  %v1511_v50 = vand.u32 2147483647, %v1501_v28 }
 0x578   :  { %v1592_v53 = vsel %vm1591_vm4, %v1589_v1, -inf  ;;  %1603 = vst.msk [vmem:[%s2425_s10] sm:$0xff] %vm1591_vm4, %v1589_v1 }
 0x579   :  { %1593 = vmax.xlane.f32.xlu0 %v1592_v53  ;;  %v1514_v27 = vor.u32 1.1754944e-38, %v1513_v60  ;;  %vm1512_vm11 = vcmp.eq.f32.partialorder %v1511_v50, 8.507059e+37 }
 0x57a   :  { %v1781_v45 = vpop.eup %1780 }
 0x57b   :  { %v1481_v47 = vadd.f32 1.0, %v1781_v45 }
 0x57d   :  { %1784 = vrcp.f32 %v1481_v47  ;;  %v1783_v9 = vpop.eup %1782  ;;  %v1493_v7 = vand.u32 2147483648, %v1481_v47  ;;  %v1491_v54 = vand.u32 2147483647, %v1481_v47  ;;  %vm1487_vm6 = vweird.f32 %v1481_v47 }
 0x57e   :  { %v1503_v0 = vmul.f32 %v1783_v9, %v1501_v28  ;;  %vm1508_vm8 = vweird.f32 %v1783_v9 }
 0x57f   :  { %v1494_v10 = vor.u32 1.1754944e-38, %v1493_v7  ;;  %vm1492_vm0 = vcmp.eq.f32.partialorder %v1491_v54, 8.507059e+37  ;;  %vm1509_vm10 = vmor %vm1507_vm9, %vm1508_vm8 }
 0x580   :  { %v1504_v4 = vsub.f32 1.0, %v1503_v0 }
 0x582   :  { %v1505_v11 = vmul.f32 %v1783_v9, %v1504_v4 }
 0x583   :  { %v1785_v2 = vpop.eup %1784 }
 0x584   :  { %v1483_v3 = vmul.f32 %v1785_v2, %v1481_v47  ;;  %vm1488_vm5 = vweird.f32 %v1785_v2  ;;  %v1506_v18 = vadd.f32 %v1783_v9, %v1505_v11 }
 0x585   :  { %vm1489_vm7 = vmor %vm1487_vm6, %vm1488_vm5 }
 0x586   :  { %v1484_v5 = vsub.f32 1.0, %v1483_v3  ;;  %v1510_v25 = vsel %vm1509_vm10, %v1783_v9, %v1506_v18 }
 0x587   :  { %v1515_v29 = vsel %vm1512_vm11, %v1514_v27, %v1510_v25 }
 0x588   :  { %v1485_v8 = vmul.f32 %v1785_v2, %v1484_v5  ;;  %v1520_v61 = vsub.f32 1.0, %v1515_v29  ;;  %v1522_v33 = vmul.f32 %v1515_v29, %v2382_v16 }
 0x58a   :  { %v1486_v57 = vadd.f32 %v1785_v2, %v1485_v8 }
 0x58c   :  { %v1490_v13 = vsel %vm1489_vm7, %v1785_v2, %v1486_v57 }
 0x58d   :  { %v1495_v58 = vsel %vm1492_vm0, %v1494_v10, %v1490_v13 }
 0x58e   :  { %v1517_v62 = vmul.f32 %v1495_v58, %v1475_v14 }
 0x590   :  { %v1518_v23 = vadd.f32 %v1517_v62, %v1412_v59 }
 0x592   :  { %1786 = vtanh.f32 %v1518_v23 }
 0x598   :  { %v1787_v30 = vpop.eup %1786 }
 0x599   :  { %v1521_v49 = vmul.f32 %v1787_v30, %v1520_v61 }
 0x59b   :  { %v1523_v34 = vadd.f32 %v1522_v33, %v1521_v49 }
 0x59d   :  { %1606 = vst.msk [vmem:[%s2426_s11] sm:$0xff] %vm182_vm1, %v1523_v34 }
 0x5ec   :  { %v1594_v63 = vpop.xlane.xlu0 %1593 }
 0x5ed   :  { %v1595_v32 = vsub.f32 %v1589_v1, %v1594_v63 }
 0x5ef   :  { %v1596_v35 = vmul.f32 1.442695, %v1595_v32 }
 0x5f1   :  { %1788 = vpow2.f32 %v1596_v35 }
 0x5f7   :  { %v1789_v55 = vpop.eup %1788 }
 0x5f8   :  { %v1598_v17 = vsel %vm1591_vm4, %v1789_v55, 0.0 }
 0x5f9   :  { %1599 = vadd.xlane.f32.xlu0 %v1598_v17 }
 0x66c   :  { %v1600_v6 = vpop.xlane.xlu0 %1599 }
 0x66d   :  { %1790 = vrcp.f32 %v1600_v6 }
 0x673   :  { %v1791_v36 = vpop.eup %1790 }
 0x674   :  { %v1602_v39 = vmul.f32 %v1791_v36, %v1789_v55 }
 0x676   :  { %1695 = vst.msk [vmem:[%s2425_s10 + $0x8] sm:$0xff] %vm1591_vm4, %v1602_v39 }
 0x677   :  { %1615 = vsyncpa [#allocation3], 1 }
 0x678   :  { %1616 = vsyncpa [#allocation5], 1 }

</bundles_post_ra>
